<compile_context>
chip_gen: v7x
topology: tpu7x:2x2x1
jax: 0.10.0
libtpu: 0.0.40
codegen_flags: <defaults>
</compile_context>

<pallas_src>
import numpy as np
import jax
import jax.numpy as jnp
from jax.experimental import pallas as pl
from jax.experimental.pallas import tpu as pltpu

# Small, forward-consistent demo config (module defaults are n_classes=1000,
# ndf=12, img_shape=[3,256,256]; we shrink classes & spatial for the demo).
N_CLASSES = 10
NDF = 12
IMG_SHAPE = (3, 16, 16)  # (C, H, W)

NDF_PAD = 128            # pad hidden width to one full lane group
LANE = 128
ROW = 16                 # bf16-safe sublane granularity for row tiles
TM_TARGET = 512          # batch-row tile target
TK_SMALL_VMEM = 8192     # layer-1 reduction tile target (64 MiB VMEM parts)
TK_LARGE_VMEM = 16384    # layer-1 reduction tile target (128 MiB VMEM parts)


def _round_up(x, m):
    return (x + m - 1) // m * m


def _cdiv(a, b):
    return -(-a // b)


def _leaky_relu(h, slope=0.2):
    return jnp.where(h > 0, h, slope * h)


def _tpu_vmem_capacity_bytes():
    """Physical per-core VMEM; conservative default if the query is unavailable."""
    try:
        return int(pltpu.get_tpu_info().vmem_capacity_bytes)
    except Exception:
        return 64 * 1024 * 1024


def _make_disclin_kernel(tk, w1_resident):
    """grid = (rows, k).  x block (TM, TK) bf16, W1 either a (TK, 128) streamed
    tile or the full (chw_pad, 128) resident slab sliced per-k in VMEM.
    acc (TM, 128) f32 is resident across k.  On the last k step: add the folded
    embedding+bias term, LeakyReLU, run the tiny resident layers 2-4 and store
    a lane-dense (TM, 128) block (column 0 = logit)."""

    def kernel(x_ref, w1_ref, embp_ref, w2_ref, b2_ref, w3_ref, b3_ref,
               w4_ref, b4_ref, out_ref, acc_ref):
        k = pl.program_id(1)

        @pl.when(k == 0)
        def _():
            acc_ref[...] = jnp.zeros_like(acc_ref)

        if w1_resident:
            start = pl.multiple_of(k * tk, LANE)
            w1_blk = w1_ref[pl.ds(start, tk), :]
        else:
            w1_blk = w1_ref[...]

        acc_ref[...] += jnp.dot(x_ref[...], w1_blk,
                                preferred_element_type=jnp.float32)

        @pl.when(k == pl.num_programs(1) - 1)
        def _():
            # embp = E[label] + b1 (zero-padded to 128 lanes), folded outside.
            h = _leaky_relu(acc_ref[...] + embp_ref[...])
            h = _leaky_relu(jnp.dot(h, w2_ref[...],
                                    preferred_element_type=jnp.float32)
                            + b2_ref[...])
            # TODO(synk): nn.Dropout(0.4) is identity in eval mode; train-mode
            # dropout (pltpu.prng_random_bits mask) intentionally omitted.
            h = _leaky_relu(jnp.dot(h, w3_ref[...],
                                    preferred_element_type=jnp.float32)
                            + b3_ref[...])
            out_ref[...] = (jnp.dot(h, w4_ref[...],
                                    preferred_element_type=jnp.float32)
                            + b4_ref[...])

    return kernel


def make_params(key, n_classes=N_CLASSES, ndf=NDF, img_shape=IMG_SHAPE):
    """Deterministic synthetic parameters (shapes match the nn.Module)."""
    d_in = n_classes + int(np.prod(img_shape))
    ks = jax.random.split(key, 9)
    scale = 0.05
    return {
        "emb": jax.random.normal(ks[0], (n_classes, n_classes), jnp.float32),
        "w1": scale * jax.random.normal(ks[1], (d_in, ndf), jnp.float32),
        "b1": scale * jax.random.normal(ks[2], (1, ndf), jnp.float32),
        "w2": scale * jax.random.normal(ks[3], (ndf, ndf), jnp.float32),
        "b2": scale * jax.random.normal(ks[4], (1, ndf), jnp.float32),
        "w3": scale * jax.random.normal(ks[5], (ndf, ndf), jnp.float32),
        "b3": scale * jax.random.normal(ks[6], (1, ndf), jnp.float32),
        "w4": scale * jax.random.normal(ks[7], (ndf, 1), jnp.float32),
        "b4": scale * jax.random.normal(ks[8], (1, 1), jnp.float32),
    }


def disclin_forward(img, labels, params, *, tm_target=TM_TARGET):
    """img: (B, C, H, W) float32 NCHW; labels: (B,) int32. Returns squeeze((B,1))."""
    B = img.shape[0]
    chw = int(np.prod(img.shape[1:]))
    ndf = params["w1"].shape[1]

    # ---- hardware-derived budgets -------------------------------------------
    vmem_cap = _tpu_vmem_capacity_bytes()
    small_vmem = vmem_cap < 96 * 1024 * 1024       # v7x-like: 64 MiB/TC, 2 TCs
    multi_tc = small_vmem                          # heuristic: small-VMEM <=> 2 TCs
    vmem_limit = (48 if small_vmem else 100) * 1024 * 1024
    tile_budget = int(vmem_limit * 0.85)           # leave compiler headroom
    tk_target = TK_SMALL_VMEM if small_vmem else TK_LARGE_VMEM
    buffered_ok = hasattr(pl, "Buffered")

    # ---- row (batch) tiling: >=2 row tiles on multi-TC parts when possible ---
    b_pad = _round_up(max(B, 1), ROW)
    n_rows = max(_cdiv(b_pad, tm_target), 2 if multi_tc else 1)
    tm = _round_up(_cdiv(b_pad, n_rows), ROW)
    n_rows = _cdiv(b_pad, tm)
    b_pad = n_rows * tm

    # ---- reduction (chw) tiling: pad to 128 lanes only, never to TK ----------
    chw_pad = _round_up(chw, LANE)
    # Cap tk so double-buffered x tiles + streamed W1 tiles use <= half budget.
    per_col_bytes = 2 * tm * 2 + 2 * NDF_PAD * 2
    tk_cap = max(LANE, (tile_budget // 2 // per_col_bytes) // LANE * LANE)
    tk_target = min(tk_target, tk_cap)
    n_k = _cdiv(chw_pad, tk_target)
    tk = _round_up(_cdiv(chw_pad, n_k), LANE)
    n_k = _cdiv(chw_pad, tk)
    chw_pad = n_k * tk

    grid = (n_rows, n_k)

    # ---- operand prep (no HBM concat; bf16 streamed/resident operands) -------
    x = img.reshape(B, chw).astype(jnp.bfloat16)
    x = jnp.pad(x, ((0, b_pad - B), (0, chw_pad - chw)))

    w1_img = jnp.pad(params["w1"][:chw].astype(jnp.bfloat16),
                     ((0, chw_pad - chw), (0, NDF_PAD - ndf)))

    # Fold the label-embedding branch of layer 1 into a per-row add:
    #   E = emb_table @ W1[chw:, :]   (n_classes, ndf)
    #   embp[b] = E[label[b]] + b1    (then zero-padded to 128 lanes)
    e_tbl = params["emb"] @ params["w1"][chw:]
    embp = jnp.take(e_tbl, labels, axis=0) + params["b1"]
    embp = jnp.pad(embp, ((0, b_pad - B), (0, NDF_PAD - ndf))).astype(jnp.bfloat16)

    w2p = jnp.pad(params["w2"], ((0, NDF_PAD - ndf), (0, NDF_PAD - ndf))).astype(jnp.bfloat16)
    b2p = jnp.pad(params["b2"], ((0, 0), (0, NDF_PAD - ndf))).astype(jnp.bfloat16)
    w3p = jnp.pad(params["w3"], ((0, NDF_PAD - ndf), (0, NDF_PAD - ndf))).astype(jnp.bfloat16)
    b3p = jnp.pad(params["b3"], ((0, 0), (0, NDF_PAD - ndf))).astype(jnp.bfloat16)
    w4p = (jnp.zeros((NDF_PAD, NDF_PAD), jnp.float32)
           .at[:ndf, 0].set(params["w4"][:, 0])).astype(jnp.bfloat16)
    b4p = (jnp.zeros((1, NDF_PAD), jnp.float32)
           .at[0, 0].set(params["b4"][0, 0])).astype(jnp.bfloat16)

    # ---- W1 residency decision (128 MiB parts; never fits v7x at full chw) ---
    def _vmem_estimate(w1_resident, w1_copies):
        if w1_resident:
            # full resident slab (+ slack for a possible materialized k-slice)
            w1_bytes = chw_pad * NDF_PAD * 2 * w1_copies + tk * NDF_PAD * 2
        else:
            w1_bytes = 2 * tk * NDF_PAD * 2
        return (2 * tm * tk * 2                 # x tiles (double-buffered)
                + w1_bytes
                + 2 * tm * NDF_PAD * 2          # embp tiles
                + 2 * tm * NDF_PAD * 4          # output tiles
                + tm * NDF_PAD * 4              # f32 accumulator scratch
                + 2 * (3 * NDF_PAD * NDF_PAD + 3 * NDF_PAD) * 2)  # layers 2-4

    w1_copies = 1 if buffered_ok else 2
    w1_fits_resident = _vmem_estimate(True, w1_copies) <= tile_budget

    # ---- build & run ----------------------------------------------------------
    def _run(optimized):
        resident_w1 = optimized and w1_fits_resident
        use_buffered = optimized and buffered_ok
        kernel = _make_disclin_kernel(tk, resident_w1)
        res_kwargs = {"pipeline_mode": pl.Buffered(1)} if use_buffered else {}

        def resident_spec(shape):
            return pl.BlockSpec(shape, lambda i, k: (0, 0), **res_kwargs)

        if resident_w1:
            w1_spec = resident_spec((chw_pad, NDF_PAD))        # whole W1 in VMEM
        else:
            w1_spec = pl.BlockSpec((tk, NDF_PAD), lambda i, k: (k, 0))

        in_specs = [
            pl.BlockSpec((tm, tk), lambda i, k: (i, k)),       # x tile
            w1_spec,                                           # W1 (tile or full)
            pl.BlockSpec((tm, NDF_PAD), lambda i, k: (i, 0)),  # folded emb + b1
            resident_spec((NDF_PAD, NDF_PAD)),                 # w2
            resident_spec((1, NDF_PAD)),                       # b2
            resident_spec((NDF_PAD, NDF_PAD)),                 # w3
            resident_spec((1, NDF_PAD)),                       # b3
            resident_spec((NDF_PAD, NDF_PAD)),                 # w4 (col 0 real)
            resident_spec((1, NDF_PAD)),                       # b4 (col 0 real)
        ]
        out_spec = pl.BlockSpec((tm, NDF_PAD), lambda i, k: (i, 0))

        flops = (2 * b_pad * chw_pad * NDF_PAD
                 + 3 * 2 * b_pad * NDF_PAD * NDF_PAD)
        w1_hbm = chw_pad * NDF_PAD * 2 * (1 if resident_w1 else n_rows)
        bytes_accessed = (b_pad * chw_pad * 2                  # x stream
                          + w1_hbm                             # W1 (re-)streams
                          + b_pad * NDF_PAD * 2                # embp
                          + b_pad * NDF_PAD * 4                # output
                          + (3 * NDF_PAD * NDF_PAD + 3 * NDF_PAD) * 2)

        return pl.pallas_call(
            kernel,
            out_shape=jax.ShapeDtypeStruct((b_pad, NDF_PAD), jnp.float32),
            grid_spec=pltpu.PrefetchScalarGridSpec(
                num_scalar_prefetch=0,
                grid=grid,
                in_specs=in_specs,
                out_specs=out_spec,
                scratch_shapes=[pltpu.VMEM((tm, NDF_PAD), jnp.float32)],
            ),
            compiler_params=pltpu.CompilerParams(
                dimension_semantics=("parallel", "arbitrary"),
                vmem_limit_bytes=vmem_limit,
            ),
            cost_estimate=pl.CostEstimate(flops=flops, transcendentals=0,
                                          bytes_accessed=bytes_accessed),
        )(x, w1_img, embp, w2p, b2p, w3p, b3p, w4p, b4p)

    try:
        out = jax.block_until_ready(_run(optimized=True))
    except Exception:
        # Capability fallback (e.g. pl.Buffered(1) unsupported on this jax
        # build): streamed W1 tiles + default double-buffered specs — identical
        # math, previously-validated configuration.
        out = jax.block_until_ready(_run(optimized=False))

    # column 0 of the lane-dense output holds the logit; torch .squeeze()
    # drops all size-1 dims (B=1 -> scalar).
    return jnp.squeeze(out[:B, 0])


def _reference_forward(img, labels, params):
    """Pure-JAX f32 reference (unfolded, concat form) for correctness."""
    B = img.shape[0]
    emb = jnp.take(params["emb"], labels, axis=0)
    h = jnp.concatenate([img.reshape(B, -1), emb], axis=-1)
    h = _leaky_relu(h @ params["w1"] + params["b1"])
    h = _leaky_relu(h @ params["w2"] + params["b2"])
    h = _leaky_relu(h @ params["w3"] + params["b3"])
    h = h @ params["w4"] + params["b4"]
    return jnp.squeeze(h)


if __name__ == "__main__":
    key = jax.random.PRNGKey(0)
    k_img, k_lbl, k_par = jax.random.split(key, 3)

    B = 2
    img = jax.random.normal(k_img, (B,) + IMG_SHAPE, jnp.float32)   # (2, 3, 16, 16)
    labels = jax.random.randint(k_lbl, (B,), 0, N_CLASSES, jnp.int32)
    params = make_params(k_par)

    out = disclin_forward(img, labels, params)
    out = jax.block_until_ready(out)

    ref = _reference_forward(img, labels, params)
    np.testing.assert_allclose(np.asarray(out), np.asarray(ref),
                               rtol=2e-2, atol=2e-2)
    assert out.shape == (B,)
    print("KERNEL_OK")
</pallas_src>

<mosaic_0001>
module attributes {stable_mosaic.version = 11 : i64} {
  func.func @kernel(%arg0: i32, %arg1: i32, %arg2: memref<16x768xbf16, #tpu.memory_space<vmem>>, %arg3: memref<768x128xbf16, #tpu.memory_space<vmem>>, %arg4: memref<16x128xbf16, #tpu.memory_space<vmem>>, %arg5: memref<128x128xbf16, #tpu.memory_space<vmem>>, %arg6: memref<1x128xbf16, #tpu.memory_space<vmem>>, %arg7: memref<128x128xbf16, #tpu.memory_space<vmem>>, %arg8: memref<1x128xbf16, #tpu.memory_space<vmem>>, %arg9: memref<128x128xbf16, #tpu.memory_space<vmem>>, %arg10: memref<1x128xbf16, #tpu.memory_space<vmem>>, %arg11: memref<16x128xf32, #tpu.memory_space<vmem>>, %arg12: memref<16x128xf32, #tpu.memory_space<vmem>>) attributes {dimension_semantics = [#tpu.dimension_semantics<parallel>, #tpu.dimension_semantics<arbitrary>], iteration_bounds = array<i64: 1, 1>, scalar_prefetch = 0 : i64, scratch_operands = 1 : i64, tpu.core_type = #tpu.core_type<tc>, window_params = [{transform_indices = @transform_0, window_bounds = array<i64: 16, 768>}, {pipeline_mode = #tpu.pipeline_mode<synchronous>, transform_indices = @transform_1, window_bounds = array<i64: 768, 128>}, {transform_indices = @transform_2, window_bounds = array<i64: 16, 128>}, {pipeline_mode = #tpu.pipeline_mode<synchronous>, transform_indices = @transform_3, window_bounds = array<i64: 128, 128>}, {pipeline_mode = #tpu.pipeline_mode<synchronous>, transform_indices = @transform_4, window_bounds = array<i64: 1, 128>}, {pipeline_mode = #tpu.pipeline_mode<synchronous>, transform_indices = @transform_5, window_bounds = array<i64: 128, 128>}, {pipeline_mode = #tpu.pipeline_mode<synchronous>, transform_indices = @transform_6, window_bounds = array<i64: 1, 128>}, {pipeline_mode = #tpu.pipeline_mode<synchronous>, transform_indices = @transform_7, window_bounds = array<i64: 128, 128>}, {pipeline_mode = #tpu.pipeline_mode<synchronous>, transform_indices = @transform_8, window_bounds = array<i64: 1, 128>}, {transform_indices = @transform_9, window_bounds = array<i64: 16, 128>}]} {
    %c0_i32 = arith.constant 0 : i32
    %0 = arith.cmpi eq, %arg1, %c0_i32 : i32
    %1 = arith.extui %0 : i1 to i32
    %c0_i32_0 = arith.constant 0 : i32
    %2 = arith.cmpi ne, %1, %c0_i32_0 : i32
    scf.if %2 {
      %cst_9 = arith.constant 0.000000e+00 : f32
      %15 = vector.broadcast %cst_9 : f32 to vector<16x128xf32>
      %c0_10 = arith.constant 0 : index
      %c0_11 = arith.constant 0 : index
      %16 = vector.load %arg12[%c0_10, %c0_11] : memref<16x128xf32, #tpu.memory_space<vmem>>, vector<16x128xf32>
      tpu.vector_store %arg12[%c0_10, %c0_11], %15 {strides = array<i32>} : memref<16x128xf32, #tpu.memory_space<vmem>>, vector<16x128xf32>,
    } else {
    }
    %c768_i32 = arith.constant 768 : i32
    %3 = arith.muli %arg1, %c768_i32 : i32
    %4 = tpu.assume_multiple %3, 128 : i32
    %5 = arith.index_cast %4 : i32 to index
    %c0 = arith.constant 0 : index
    %6 = vector.load %arg3[%5, %c0] : memref<768x128xbf16, #tpu.memory_space<vmem>>, vector<768x128xbf16>
    %c0_1 = arith.constant 0 : index
    %c0_2 = arith.constant 0 : index
    %7 = vector.load %arg12[%c0_1, %c0_2] : memref<16x128xf32, #tpu.memory_space<vmem>>, vector<16x128xf32>
    %c0_3 = arith.constant 0 : index
    %c0_4 = arith.constant 0 : index
    %8 = vector.load %arg2[%c0_3, %c0_4] : memref<16x768xbf16, #tpu.memory_space<vmem>>, vector<16x768xbf16>
    %cst = arith.constant dense<0.000000e+00> : vector<16x128xf32>
    %9 = tpu.matmul %8, %6, %cst {dimension_numbers = #tpu.dot_dimension_numbers<[1], [0], [0], [1], [0, 0, 1, 1], [], []>} : vector<16x768xbf16>, vector<768x128xbf16>, vector<16x128xf32> -> vector<16x128xf32>
    %10 = arith.addf %7, %9 : vector<16x128xf32>
    %c0_5 = arith.constant 0 : index
    %c0_6 = arith.constant 0 : index
    %11 = vector.load %arg12[%c0_5, %c0_6] : memref<16x128xf32, #tpu.memory_space<vmem>>, vector<16x128xf32>
    tpu.vector_store %arg12[%c0_5, %c0_6], %10 {strides = array<i32>} : memref<16x128xf32, #tpu.memory_space<vmem>>, vector<16x128xf32>,
    %c0_i32_7 = arith.constant 0 : i32
    %12 = arith.cmpi eq, %arg1, %c0_i32_7 : i32
    %13 = arith.extui %12 : i1 to i32
    %c0_i32_8 = arith.constant 0 : i32
    %14 = arith.cmpi ne, %13, %c0_i32_8 : i32
    scf.if %14 {
      %c0_9 = arith.constant 0 : index
      %c0_10 = arith.constant 0 : index
      %15 = vector.load %arg12[%c0_9, %c0_10] : memref<16x128xf32, #tpu.memory_space<vmem>>, vector<16x128xf32>
      %c0_11 = arith.constant 0 : index
      %c0_12 = arith.constant 0 : index
      %16 = vector.load %arg4[%c0_11, %c0_12] : memref<16x128xbf16, #tpu.memory_space<vmem>>, vector<16x128xbf16>
      %17 = arith.extf %16 : vector<16x128xbf16> to vector<16x128xf32>
      %18 = arith.addf %15, %17 : vector<16x128xf32>
      %cst_13 = arith.constant 0.000000e+00 : f32
      %19 = vector.broadcast %cst_13 : f32 to vector<16x128xf32>
      %20 = arith.cmpf ogt, %18, %19 : vector<16x128xf32>
      %cst_14 = arith.constant 2.000000e-01 : f32
      %21 = vector.broadcast %cst_14 : f32 to vector<16x128xf32>
      %22 = arith.mulf %21, %18 : vector<16x128xf32>
      %23 = arith.select %20, %18, %22 : vector<16x128xi1>, vector<16x128xf32>
      %c0_15 = arith.constant 0 : index
      %c0_16 = arith.constant 0 : index
      %24 = vector.load %arg5[%c0_15, %c0_16] : memref<128x128xbf16, #tpu.memory_space<vmem>>, vector<128x128xbf16>
      %cst_17 = arith.constant dense<0.000000e+00> : vector<16x128xf32>
      %25 = tpu.matmul %23, %24, %cst_17 {dimension_numbers = #tpu.dot_dimension_numbers<[1], [0], [0], [1], [0, 0, 1, 1], [], []>} : vector<16x128xf32>, vector<128x128xbf16>, vector<16x128xf32> -> vector<16x128xf32>
      %c0_18 = arith.constant 0 : index
      %c0_19 = arith.constant 0 : index
      %26 = vector.load %arg6[%c0_18, %c0_19] : memref<1x128xbf16, #tpu.memory_space<vmem>>, vector<1x128xbf16>
      %27 = arith.extf %26 : vector<1x128xbf16> to vector<1x128xf32>
      %28 = vector.broadcast %27 : vector<1x128xf32> to vector<16x128xf32>
      %29 = arith.addf %25, %28 : vector<16x128xf32>
      %cst_20 = arith.constant 0.000000e+00 : f32
      %30 = vector.broadcast %cst_20 : f32 to vector<16x128xf32>
      %31 = arith.cmpf ogt, %29, %30 : vector<16x128xf32>
      %cst_21 = arith.constant 2.000000e-01 : f32
      %32 = vector.broadcast %cst_21 : f32 to vector<16x128xf32>
      %33 = arith.mulf %32, %29 : vector<16x128xf32>
      %34 = arith.select %31, %29, %33 : vector<16x128xi1>, vector<16x128xf32>
      %c0_22 = arith.constant 0 : index
      %c0_23 = arith.constant 0 : index
      %35 = vector.load %arg7[%c0_22, %c0_23] : memref<128x128xbf16, #tpu.memory_space<vmem>>, vector<128x128xbf16>
      %cst_24 = arith.constant dense<0.000000e+00> : vector<16x128xf32>
      %36 = tpu.matmul %34, %35, %cst_24 {dimension_numbers = #tpu.dot_dimension_numbers<[1], [0], [0], [1], [0, 0, 1, 1], [], []>} : vector<16x128xf32>, vector<128x128xbf16>, vector<16x128xf32> -> vector<16x128xf32>
      %c0_25 = arith.constant 0 : index
      %c0_26 = arith.constant 0 : index
      %37 = vector.load %arg8[%c0_25, %c0_26] : memref<1x128xbf16, #tpu.memory_space<vmem>>, vector<1x128xbf16>
      %38 = arith.extf %37 : vector<1x128xbf16> to vector<1x128xf32>
      %39 = vector.broadcast %38 : vector<1x128xf32> to vector<16x128xf32>
      %40 = arith.addf %36, %39 : vector<16x128xf32>
      %cst_27 = arith.constant 0.000000e+00 : f32
      %41 = vector.broadcast %cst_27 : f32 to vector<16x128xf32>
      %42 = arith.cmpf ogt, %40, %41 : vector<16x128xf32>
      %cst_28 = arith.constant 2.000000e-01 : f32
      %43 = vector.broadcast %cst_28 : f32 to vector<16x128xf32>
      %44 = arith.mulf %43, %40 : vector<16x128xf32>
      %45 = arith.select %42, %40, %44 : vector<16x128xi1>, vector<16x128xf32>
      %c0_29 = arith.constant 0 : index
      %c0_30 = arith.constant 0 : index
      %46 = vector.load %arg9[%c0_29, %c0_30] : memref<128x128xbf16, #tpu.memory_space<vmem>>, vector<128x128xbf16>
      %cst_31 = arith.constant dense<0.000000e+00> : vector<16x128xf32>
      %47 = tpu.matmul %45, %46, %cst_31 {dimension_numbers = #tpu.dot_dimension_numbers<[1], [0], [0], [1], [0, 0, 1, 1], [], []>} : vector<16x128xf32>, vector<128x128xbf16>, vector<16x128xf32> -> vector<16x128xf32>
      %c0_32 = arith.constant 0 : index
      %c0_33 = arith.constant 0 : index
      %48 = vector.load %arg10[%c0_32, %c0_33] : memref<1x128xbf16, #tpu.memory_space<vmem>>, vector<1x128xbf16>
      %49 = arith.extf %48 : vector<1x128xbf16> to vector<1x128xf32>
      %50 = vector.broadcast %49 : vector<1x128xf32> to vector<16x128xf32>
      %51 = arith.addf %47, %50 : vector<16x128xf32>
      %c0_34 = arith.constant 0 : index
      %c0_35 = arith.constant 0 : index
      %52 = vector.load %arg11[%c0_34, %c0_35] : memref<16x128xf32, #tpu.memory_space<vmem>>, vector<16x128xf32>
      tpu.vector_store %arg11[%c0_34, %c0_35], %51 {strides = array<i32>} : memref<16x128xf32, #tpu.memory_space<vmem>>, vector<16x128xf32>,
    } else {
    }
    return
  }
  func.func @transform_0(%arg0: i32, %arg1: i32) -> (i32, i32) {
    %c0_i32 = arith.constant 0 : i32
    return %arg0, %arg1 : i32, i32
  }
  func.func @transform_1(%arg0: i32, %arg1: i32) -> (i32, i32) {
    %c0_i32 = arith.constant 0 : i32
    %c0_i32_0 = arith.constant 0 : i32
    %c0_i32_1 = arith.constant 0 : i32
    return %c0_i32, %c0_i32_0 : i32, i32
  }
  func.func @transform_2(%arg0: i32, %arg1: i32) -> (i32, i32) {
    %c0_i32 = arith.constant 0 : i32
    %c0_i32_0 = arith.constant 0 : i32
    return %arg0, %c0_i32 : i32, i32
  }
  func.func @transform_3(%arg0: i32, %arg1: i32) -> (i32, i32) {
    %c0_i32 = arith.constant 0 : i32
    %c0_i32_0 = arith.constant 0 : i32
    %c0_i32_1 = arith.constant 0 : i32
    return %c0_i32, %c0_i32_0 : i32, i32
  }
  func.func @transform_4(%arg0: i32, %arg1: i32) -> (i32, i32) {
    %c0_i32 = arith.constant 0 : i32
    %c0_i32_0 = arith.constant 0 : i32
    %c0_i32_1 = arith.constant 0 : i32
    return %c0_i32, %c0_i32_0 : i32, i32
  }
  func.func @transform_5(%arg0: i32, %arg1: i32) -> (i32, i32) {
    %c0_i32 = arith.constant 0 : i32
    %c0_i32_0 = arith.constant 0 : i32
    %c0_i32_1 = arith.constant 0 : i32
    return %c0_i32, %c0_i32_0 : i32, i32
  }
  func.func @transform_6(%arg0: i32, %arg1: i32) -> (i32, i32) {
    %c0_i32 = arith.constant 0 : i32
    %c0_i32_0 = arith.constant 0 : i32
    %c0_i32_1 = arith.constant 0 : i32
    return %c0_i32, %c0_i32_0 : i32, i32
  }
  func.func @transform_7(%arg0: i32, %arg1: i32) -> (i32, i32) {
    %c0_i32 = arith.constant 0 : i32
    %c0_i32_0 = arith.constant 0 : i32
    %c0_i32_1 = arith.constant 0 : i32
    return %c0_i32, %c0_i32_0 : i32, i32
  }
  func.func @transform_8(%arg0: i32, %arg1: i32) -> (i32, i32) {
    %c0_i32 = arith.constant 0 : i32
    %c0_i32_0 = arith.constant 0 : i32
    %c0_i32_1 = arith.constant 0 : i32
    return %c0_i32, %c0_i32_0 : i32, i32
  }
  func.func @transform_9(%arg0: i32, %arg1: i32) -> (i32, i32) {
    %c0_i32 = arith.constant 0 : i32
    %c0_i32_0 = arith.constant 0 : i32
    return %arg0, %c0_i32 : i32, i32
  }
}

module attributes {stable_mosaic.version = 11 : i64} {
  func.func @kernel(%arg0: i32, %arg1: i32, %arg2: memref<16x768xbf16, #tpu.memory_space<vmem>>, %arg3: memref<768x128xbf16, #tpu.memory_space<vmem>>, %arg4: memref<16x128xbf16, #tpu.memory_space<vmem>>, %arg5: memref<128x128xbf16, #tpu.memory_space<vmem>>, %arg6: memref<1x128xbf16, #tpu.memory_space<vmem>>, %arg7: memref<128x128xbf16, #tpu.memory_space<vmem>>, %arg8: memref<1x128xbf16, #tpu.memory_space<vmem>>, %arg9: memref<128x128xbf16, #tpu.memory_space<vmem>>, %arg10: memref<1x128xbf16, #tpu.memory_space<vmem>>, %arg11: memref<16x128xf32, #tpu.memory_space<vmem>>, %arg12: memref<16x128xf32, #tpu.memory_space<vmem>>) attributes {dimension_semantics = [#tpu.dimension_semantics<parallel>, #tpu.dimension_semantics<arbitrary>], iteration_bounds = array<i64: 1, 1>, scalar_prefetch = 0 : i64, scratch_operands = 1 : i64, tpu.core_type = #tpu.core_type<tc>, window_params = [{transform_indices = @transform_0, window_bounds = array<i64: 16, 768>}, {transform_indices = @transform_1, window_bounds = array<i64: 768, 128>}, {transform_indices = @transform_2, window_bounds = array<i64: 16, 128>}, {pipeline_mode = #tpu.pipeline_mode<synchronous>, transform_indices = @transform_3, window_bounds = array<i64: 128, 128>}, {pipeline_mode = #tpu.pipeline_mode<synchronous>, transform_indices = @transform_4, window_bounds = array<i64: 1, 128>}, {pipeline_mode = #tpu.pipeline_mode<synchronous>, transform_indices = @transform_5, window_bounds = array<i64: 128, 128>}, {pipeline_mode = #tpu.pipeline_mode<synchronous>, transform_indices = @transform_6, window_bounds = array<i64: 1, 128>}, {pipeline_mode = #tpu.pipeline_mode<synchronous>, transform_indices = @transform_7, window_bounds = array<i64: 128, 128>}, {pipeline_mode = #tpu.pipeline_mode<synchronous>, transform_indices = @transform_8, window_bounds = array<i64: 1, 128>}, {transform_indices = @transform_9, window_bounds = array<i64: 16, 128>}]} {
    %c0_i32 = arith.constant 0 : i32
    %0 = arith.cmpi eq, %arg1, %c0_i32 : i32
    %1 = arith.extui %0 : i1 to i32
    %c0_i32_0 = arith.constant 0 : i32
    %2 = arith.cmpi ne, %1, %c0_i32_0 : i32
    scf.if %2 {
      %cst_10 = arith.constant 0.000000e+00 : f32
      %12 = vector.broadcast %cst_10 : f32 to vector<16x128xf32>
      %c0_11 = arith.constant 0 : index
      %c0_12 = arith.constant 0 : index
      %13 = vector.load %arg12[%c0_11, %c0_12] : memref<16x128xf32, #tpu.memory_space<vmem>>, vector<16x128xf32>
      tpu.vector_store %arg12[%c0_11, %c0_12], %12 {strides = array<i32>} : memref<16x128xf32, #tpu.memory_space<vmem>>, vector<16x128xf32>,
    } else {
    }
    %c0 = arith.constant 0 : index
    %c0_1 = arith.constant 0 : index
    %3 = vector.load %arg3[%c0, %c0_1] : memref<768x128xbf16, #tpu.memory_space<vmem>>, vector<768x128xbf16>
    %c0_2 = arith.constant 0 : index
    %c0_3 = arith.constant 0 : index
    %4 = vector.load %arg12[%c0_2, %c0_3] : memref<16x128xf32, #tpu.memory_space<vmem>>, vector<16x128xf32>
    %c0_4 = arith.constant 0 : index
    %c0_5 = arith.constant 0 : index
    %5 = vector.load %arg2[%c0_4, %c0_5] : memref<16x768xbf16, #tpu.memory_space<vmem>>, vector<16x768xbf16>
    %cst = arith.constant dense<0.000000e+00> : vector<16x128xf32>
    %6 = tpu.matmul %5, %3, %cst {dimension_numbers = #tpu.dot_dimension_numbers<[1], [0], [0], [1], [0, 0, 1, 1], [], []>} : vector<16x768xbf16>, vector<768x128xbf16>, vector<16x128xf32> -> vector<16x128xf32>
    %7 = arith.addf %4, %6 : vector<16x128xf32>
    %c0_6 = arith.constant 0 : index
    %c0_7 = arith.constant 0 : index
    %8 = vector.load %arg12[%c0_6, %c0_7] : memref<16x128xf32, #tpu.memory_space<vmem>>, vector<16x128xf32>
    tpu.vector_store %arg12[%c0_6, %c0_7], %7 {strides = array<i32>} : memref<16x128xf32, #tpu.memory_space<vmem>>, vector<16x128xf32>,
    %c0_i32_8 = arith.constant 0 : i32
    %9 = arith.cmpi eq, %arg1, %c0_i32_8 : i32
    %10 = arith.extui %9 : i1 to i32
    %c0_i32_9 = arith.constant 0 : i32
    %11 = arith.cmpi ne, %10, %c0_i32_9 : i32
    scf.if %11 {
      %c0_10 = arith.constant 0 : index
      %c0_11 = arith.constant 0 : index
      %12 = vector.load %arg12[%c0_10, %c0_11] : memref<16x128xf32, #tpu.memory_space<vmem>>, vector<16x128xf32>
      %c0_12 = arith.constant 0 : index
      %c0_13 = arith.constant 0 : index
      %13 = vector.load %arg4[%c0_12, %c0_13] : memref<16x128xbf16, #tpu.memory_space<vmem>>, vector<16x128xbf16>
      %14 = arith.extf %13 : vector<16x128xbf16> to vector<16x128xf32>
      %15 = arith.addf %12, %14 : vector<16x128xf32>
      %cst_14 = arith.constant 0.000000e+00 : f32
      %16 = vector.broadcast %cst_14 : f32 to vector<16x128xf32>
      %17 = arith.cmpf ogt, %15, %16 : vector<16x128xf32>
      %cst_15 = arith.constant 2.000000e-01 : f32
      %18 = vector.broadcast %cst_15 : f32 to vector<16x128xf32>
      %19 = arith.mulf %18, %15 : vector<16x128xf32>
      %20 = arith.select %17, %15, %19 : vector<16x128xi1>, vector<16x128xf32>
      %c0_16 = arith.constant 0 : index
      %c0_17 = arith.constant 0 : index
      %21 = vector.load %arg5[%c0_16, %c0_17] : memref<128x128xbf16, #tpu.memory_space<vmem>>, vector<128x128xbf16>
      %cst_18 = arith.constant dense<0.000000e+00> : vector<16x128xf32>
      %22 = tpu.matmul %20, %21, %cst_18 {dimension_numbers = #tpu.dot_dimension_numbers<[1], [0], [0], [1], [0, 0, 1, 1], [], []>} : vector<16x128xf32>, vector<128x128xbf16>, vector<16x128xf32> -> vector<16x128xf32>
      %c0_19 = arith.constant 0 : index
      %c0_20 = arith.constant 0 : index
      %23 = vector.load %arg6[%c0_19, %c0_20] : memref<1x128xbf16, #tpu.memory_space<vmem>>, vector<1x128xbf16>
      %24 = arith.extf %23 : vector<1x128xbf16> to vector<1x128xf32>
      %25 = vector.broadcast %24 : vector<1x128xf32> to vector<16x128xf32>
      %26 = arith.addf %22, %25 : vector<16x128xf32>
      %cst_21 = arith.constant 0.000000e+00 : f32
      %27 = vector.broadcast %cst_21 : f32 to vector<16x128xf32>
      %28 = arith.cmpf ogt, %26, %27 : vector<16x128xf32>
      %cst_22 = arith.constant 2.000000e-01 : f32
      %29 = vector.broadcast %cst_22 : f32 to vector<16x128xf32>
      %30 = arith.mulf %29, %26 : vector<16x128xf32>
      %31 = arith.select %28, %26, %30 : vector<16x128xi1>, vector<16x128xf32>
      %c0_23 = arith.constant 0 : index
      %c0_24 = arith.constant 0 : index
      %32 = vector.load %arg7[%c0_23, %c0_24] : memref<128x128xbf16, #tpu.memory_space<vmem>>, vector<128x128xbf16>
      %cst_25 = arith.constant dense<0.000000e+00> : vector<16x128xf32>
      %33 = tpu.matmul %31, %32, %cst_25 {dimension_numbers = #tpu.dot_dimension_numbers<[1], [0], [0], [1], [0, 0, 1, 1], [], []>} : vector<16x128xf32>, vector<128x128xbf16>, vector<16x128xf32> -> vector<16x128xf32>
      %c0_26 = arith.constant 0 : index
      %c0_27 = arith.constant 0 : index
      %34 = vector.load %arg8[%c0_26, %c0_27] : memref<1x128xbf16, #tpu.memory_space<vmem>>, vector<1x128xbf16>
      %35 = arith.extf %34 : vector<1x128xbf16> to vector<1x128xf32>
      %36 = vector.broadcast %35 : vector<1x128xf32> to vector<16x128xf32>
      %37 = arith.addf %33, %36 : vector<16x128xf32>
      %cst_28 = arith.constant 0.000000e+00 : f32
      %38 = vector.broadcast %cst_28 : f32 to vector<16x128xf32>
      %39 = arith.cmpf ogt, %37, %38 : vector<16x128xf32>
      %cst_29 = arith.constant 2.000000e-01 : f32
      %40 = vector.broadcast %cst_29 : f32 to vector<16x128xf32>
      %41 = arith.mulf %40, %37 : vector<16x128xf32>
      %42 = arith.select %39, %37, %41 : vector<16x128xi1>, vector<16x128xf32>
      %c0_30 = arith.constant 0 : index
      %c0_31 = arith.constant 0 : index
      %43 = vector.load %arg9[%c0_30, %c0_31] : memref<128x128xbf16, #tpu.memory_space<vmem>>, vector<128x128xbf16>
      %cst_32 = arith.constant dense<0.000000e+00> : vector<16x128xf32>
      %44 = tpu.matmul %42, %43, %cst_32 {dimension_numbers = #tpu.dot_dimension_numbers<[1], [0], [0], [1], [0, 0, 1, 1], [], []>} : vector<16x128xf32>, vector<128x128xbf16>, vector<16x128xf32> -> vector<16x128xf32>
      %c0_33 = arith.constant 0 : index
      %c0_34 = arith.constant 0 : index
      %45 = vector.load %arg10[%c0_33, %c0_34] : memref<1x128xbf16, #tpu.memory_space<vmem>>, vector<1x128xbf16>
      %46 = arith.extf %45 : vector<1x128xbf16> to vector<1x128xf32>
      %47 = vector.broadcast %46 : vector<1x128xf32> to vector<16x128xf32>
      %48 = arith.addf %44, %47 : vector<16x128xf32>
      %c0_35 = arith.constant 0 : index
      %c0_36 = arith.constant 0 : index
      %49 = vector.load %arg11[%c0_35, %c0_36] : memref<16x128xf32, #tpu.memory_space<vmem>>, vector<16x128xf32>
      tpu.vector_store %arg11[%c0_35, %c0_36], %48 {strides = array<i32>} : memref<16x128xf32, #tpu.memory_space<vmem>>, vector<16x128xf32>,
    } else {
    }
    return
  }
  func.func @transform_0(%arg0: i32, %arg1: i32) -> (i32, i32) {
    %c0_i32 = arith.constant 0 : i32
    return %arg0, %arg1 : i32, i32
  }
  func.func @transform_1(%arg0: i32, %arg1: i32) -> (i32, i32) {
    %c0_i32 = arith.constant 0 : i32
    %c0_i32_0 = arith.constant 0 : i32
    return %arg1, %c0_i32 : i32, i32
  }
  func.func @transform_2(%arg0: i32, %arg1: i32) -> (i32, i32) {
    %c0_i32 = arith.constant 0 : i32
    %c0_i32_0 = arith.constant 0 : i32
    return %arg0, %c0_i32 : i32, i32
  }
  func.func @transform_3(%arg0: i32, %arg1: i32) -> (i32, i32) {
    %c0_i32 = arith.constant 0 : i32
    %c0_i32_0 = arith.constant 0 : i32
    %c0_i32_1 = arith.constant 0 : i32
    return %c0_i32, %c0_i32_0 : i32, i32
  }
  func.func @transform_4(%arg0: i32, %arg1: i32) -> (i32, i32) {
    %c0_i32 = arith.constant 0 : i32
    %c0_i32_0 = arith.constant 0 : i32
    %c0_i32_1 = arith.constant 0 : i32
    return %c0_i32, %c0_i32_0 : i32, i32
  }
  func.func @transform_5(%arg0: i32, %arg1: i32) -> (i32, i32) {
    %c0_i32 = arith.constant 0 : i32
    %c0_i32_0 = arith.constant 0 : i32
    %c0_i32_1 = arith.constant 0 : i32
    return %c0_i32, %c0_i32_0 : i32, i32
  }
  func.func @transform_6(%arg0: i32, %arg1: i32) -> (i32, i32) {
    %c0_i32 = arith.constant 0 : i32
    %c0_i32_0 = arith.constant 0 : i32
    %c0_i32_1 = arith.constant 0 : i32
    return %c0_i32, %c0_i32_0 : i32, i32
  }
  func.func @transform_7(%arg0: i32, %arg1: i32) -> (i32, i32) {
    %c0_i32 = arith.constant 0 : i32
    %c0_i32_0 = arith.constant 0 : i32
    %c0_i32_1 = arith.constant 0 : i32
    return %c0_i32, %c0_i32_0 : i32, i32
  }
  func.func @transform_8(%arg0: i32, %arg1: i32) -> (i32, i32) {
    %c0_i32 = arith.constant 0 : i32
    %c0_i32_0 = arith.constant 0 : i32
    %c0_i32_1 = arith.constant 0 : i32
    return %c0_i32, %c0_i32_0 : i32, i32
  }
  func.func @transform_9(%arg0: i32, %arg1: i32) -> (i32, i32) {
    %c0_i32 = arith.constant 0 : i32
    %c0_i32_0 = arith.constant 0 : i32
    return %arg0, %c0_i32 : i32, i32
  }
}

</mosaic_0001>

<bundles_post_ra>
// kernel: tpu_custom_call.1
= control target key start
LH: loop header
LB: loop body
LE: loop exit
PB: predicated region body
PF: predicated region fallthrough
CT: control target
= control target key end

     0   :  { %14 = vsyncpa [#allocation4], 0  ;;  %s1732_s0 = inlined_call_operand.hbm [shape: bf16[16,768], index: 0, kind: input, shape index: {}]   ;;  %s1733_s1 = inlined_call_operand.hbm [shape: bf16[768,128], index: 1, kind: input, shape index: {}]   ;;  %s1734_s2 = inlined_call_operand.hbm [shape: bf16[16,128], index: 2, kind: input, shape index: {}]   ;;  %s1735_s3 = inlined_call_operand.hbm [shape: bf16[128,128], index: 3, kind: input, shape index: {}]   ;;  %s1736_s4 = inlined_call_operand.vmem [shape: bf16[1,128], index: 4, kind: input, shape index: {}]   ;;  %s1737_s5 = inlined_call_operand.hbm [shape: bf16[128,128], index: 5, kind: input, shape index: {}]   ;;  %s1738_s6 = inlined_call_operand.vmem [shape: bf16[1,128], index: 6, kind: input, shape index: {}]   ;;  %s1739_s7 = inlined_call_operand.hbm [shape: bf16[128,128], index: 7, kind: input, shape index: {}]   ;;  %s1740_s8 = inlined_call_operand.vmem [shape: bf16[1,128], index: 8, kind: input, shape index: {}]   ;;  %s1741_s9 = inlined_call_operand.hbm [shape: f32[16,128], index: 9, kind: output, shape index: {}]  }
   0x1   :  { %15 = vsyncpa [#allocation7], 0 }
   0x2   :  { %16 = vsyncpa [#allocation10], 0 }
   0x3   :  { %17 = vsyncpa [#allocation13], 0 }
   0x4   :  { %18 = vsyncpa [#allocation5], 0  ;;  %s1561_s30 = smov [#allocation6]   ;;  %s1397_s13 = scalar_lea.hbm %s1733_s1, 6144 }
   0x5   :  { %s36_s10 = sshll.u32 %s1561_s30, 4  ;;  %p1398_p0 = scmp.ne.s32.totalorder %s1733_s1, %s1397_s13  ;;  %s37_s10 = int_to_ptr.vmem [resolvable:$true] %s36_s10 }
   0x6   :  { %p1401_p1 = scmp.lt.u32.totalorder %s1397_s13, %s1733_s1 }
   0x8   :  { %p1403_p2 = pnand %p1401_p1, %p1398_p0 }
   0xa   :  { %1406 = shalt.err (!%p1403_p2)
}
   0xb   :  { %s1407_s18 = scalar_lea.vmem %s37_s10, 6144  ;;  %p1412_p4 = scmp.lt.s32.totalorder %s37_s10, %s37_s10 }
   0xc   :  { %p1408_p3 = scmp.ne.s32.totalorder %s37_s10, %s1407_s18  ;;  %p1413_p5 = scmp.lt.s32.totalorder %s1407_s18, %s1407_s18 }
   0xe   :  { %p1414_p6 = por %p1413_p5, %p1412_p4 }
  0x10   :  { %p1415_p7 = pnand %p1414_p6, %p1408_p3 }
  0x12   :  { %1418 = shalt.err (!%p1415_p7)
}
  0x13   :  { %s1562_s19 = smov 64   ;;  %s1563_s20 = smov 4  }
  0x14   :  { %42 = dma.hbm_to_vmem [thread:$0]  %s1733_s1, 6144, %s37_s10, [#allocation7], %s1562_s19, %s1562_s19, %s1563_s20  }
  0x15   :  { %s1564_s23 = smov [#allocation9]   ;;  %s1565_s25 = smov [#allocation3]  }
  0x16   :  { %s60_s24 = sshll.u32 %s1564_s23, 4  ;;  %s24_s26 = sshll.u32 %s1565_s25, 4  ;;  %s61_s24 = int_to_ptr.vmem [resolvable:$true] %s60_s24  ;;  %s25_s26 = int_to_ptr.vmem [resolvable:$true] %s24_s26 }
  0x17   :  { %s1419_s29 = scalar_lea.hbm %s1735_s3, 1024 }
  0x18   :  { %p1420_p8 = scmp.ne.s32.totalorder %s1735_s3, %s1419_s29  ;;  %p1423_p9 = scmp.lt.u32.totalorder %s1419_s29, %s1735_s3 }
  0x1a   :  { %p1425_p10 = pnand %p1423_p9, %p1420_p8 }
  0x1c   :  { %1428 = shalt.err (!%p1425_p10)
}
  0x1d   :  { %s1429_s1 = scalar_lea.vmem %s61_s24, 1024  ;;  %p1434_p12 = scmp.lt.s32.totalorder %s61_s24, %s61_s24 }
  0x1e   :  { %p1430_p11 = scmp.ne.s32.totalorder %s61_s24, %s1429_s1  ;;  %p1435_p13 = scmp.lt.s32.totalorder %s1429_s1, %s1429_s1 }
  0x20   :  { %p1436_p0 = por %p1435_p13, %p1434_p12 }
  0x22   :  { %p1437_p1 = pnand %p1436_p0, %p1430_p11 }
  0x24   :  { %1440 = shalt.err (!%p1437_p1)
}
  0x25   :  { %66 = dma.hbm_to_vmem [thread:$0]  %s1735_s3, 1024, %s61_s24, [#allocation10], %s1562_s19, %s1562_s19, %s1563_s20  }
  0x26   :  { %s1441_s17 = scalar_lea.hbm %s1732_s0, 768 }
  0x27   :  { %p1442_p2 = scmp.ne.s32.totalorder %s1732_s0, %s1441_s17  ;;  %p1445_p3 = scmp.lt.u32.totalorder %s1441_s17, %s1732_s0 }
  0x29   :  { %p1447_p4 = pnand %p1445_p3, %p1442_p2 }
  0x2b   :  { %1450 = shalt.err (!%p1447_p4)
}
  0x2c   :  { %s1451_s25 = scalar_lea.vmem %s25_s26, 768  ;;  %p1456_p6 = scmp.lt.s32.totalorder %s25_s26, %s25_s26 }
  0x2d   :  { %p1452_p5 = scmp.ne.s32.totalorder %s25_s26, %s1451_s25  ;;  %p1457_p7 = scmp.lt.s32.totalorder %s1451_s25, %s1451_s25 }
  0x2f   :  { %p1458_p8 = por %p1457_p7, %p1456_p6 }
  0x31   :  { %p1459_p9 = pnand %p1458_p8, %p1452_p5 }
  0x33   :  { %1462 = shalt.err (!%p1459_p9)
}
  0x34   :  { %s1566_s3 = smov 384   ;;  %s1567_s24 = smov 24  }
  0x35   :  { %30 = dma.hbm_to_vmem [thread:$0]  %s1732_s0, 768, %s25_s26, [#allocation4], %s1566_s3, %s1566_s3, %s1567_s24  }
  0x36   :  { %s1568_s29 = smov [#allocation8]   ;;  %s1569_s11 = smov [#allocation11]  }
  0x37   :  { %s48_s30 = sshll.u32 %s1568_s29, 4  ;;  %s74_s12 = sshll.u32 %s1569_s11, 4  ;;  %s49_s30 = int_to_ptr.vmem [resolvable:$true] %s48_s30  ;;  %s75_s12 = int_to_ptr.vmem [resolvable:$true] %s74_s12 }
  0x38   :  { %s1463_s10 = scalar_lea.hbm %s1734_s2, 128 }
  0x39   :  { %p1464_p10 = scmp.ne.s32.totalorder %s1734_s2, %s1463_s10  ;;  %p1467_p11 = scmp.lt.u32.totalorder %s1463_s10, %s1734_s2 }
  0x3b   :  { %p1469_p12 = pnand %p1467_p11, %p1464_p10 }
  0x3d   :  { %1472 = shalt.err (!%p1469_p12)
}
  0x3e   :  { %s1473_s0 = scalar_lea.vmem %s49_s30, 128  ;;  %p1478_p0 = scmp.lt.s32.totalorder %s49_s30, %s49_s30 }
  0x3f   :  { %p1474_p13 = scmp.ne.s32.totalorder %s49_s30, %s1473_s0  ;;  %p1479_p1 = scmp.lt.s32.totalorder %s1473_s0, %s1473_s0 }
  0x41   :  { %p1480_p2 = por %p1479_p1, %p1478_p0 }
  0x43   :  { %p1481_p3 = pnand %p1480_p2, %p1474_p13 }
  0x45   :  { %1484 = shalt.err (!%p1481_p3)
}
  0x46   :  { %54 = dma.hbm_to_vmem [thread:$0]  %s1734_s2, 128, %s49_s30, [#allocation7], %s1562_s19, %s1562_s19, %s1563_s20  }
  0x47   :  { %s1485_s23 = scalar_lea.hbm %s1737_s5, 1024 }
  0x48   :  { %p1486_p4 = scmp.ne.s32.totalorder %s1737_s5, %s1485_s23  ;;  %p1489_p5 = scmp.lt.u32.totalorder %s1485_s23, %s1737_s5 }
  0x4a   :  { %p1491_p6 = pnand %p1489_p5, %p1486_p4 }
  0x4c   :  { %1494 = shalt.err (!%p1491_p6)
}
  0x4d   :  { %s1495_s28 = scalar_lea.vmem %s75_s12, 1024  ;;  %p1500_p8 = scmp.lt.s32.totalorder %s75_s12, %s75_s12 }
  0x4e   :  { %p1496_p7 = scmp.ne.s32.totalorder %s75_s12, %s1495_s28  ;;  %p1501_p9 = scmp.lt.s32.totalorder %s1495_s28, %s1495_s28 }
  0x50   :  { %p1502_p10 = por %p1501_p9, %p1500_p8 }
  0x52   :  { %p1503_p11 = pnand %p1502_p10, %p1496_p7 }
  0x54   :  { %1506 = shalt.err (!%p1503_p11)
}
  0x55   :  { %80 = dma.hbm_to_vmem [thread:$0]  %s1737_s5, 1024, %s75_s12, [#allocation10], %s1562_s19, %s1562_s19, %s1563_s20  }
  0x56   :  { %s1570_s30 = smov [#allocation12]   ;;  %s1507_s10 = scalar_lea.hbm %s1739_s7, 1024 }
  0x57   :  { %s88_s11 = sshll.u32 %s1570_s30, 4  ;;  %p1508_p12 = scmp.ne.s32.totalorder %s1739_s7, %s1507_s10  ;;  %s89_s11 = int_to_ptr.vmem [resolvable:$true] %s88_s11 }
  0x58   :  { %p1511_p13 = scmp.lt.u32.totalorder %s1507_s10, %s1739_s7 }
  0x5a   :  { %p1513_p0 = pnand %p1511_p13, %p1508_p12 }
  0x5c   :  { %1516 = shalt.err (!%p1513_p0)
}
  0x5d   :  { %s1517_s0 = scalar_lea.vmem %s89_s11, 1024  ;;  %p1522_p2 = scmp.lt.s32.totalorder %s89_s11, %s89_s11 }
  0x5e   :  { %p1518_p1 = scmp.ne.s32.totalorder %s89_s11, %s1517_s0  ;;  %p1523_p3 = scmp.lt.s32.totalorder %s1517_s0, %s1517_s0 }
  0x60   :  { %p1524_p4 = por %p1523_p3, %p1522_p2 }
  0x62   :  { %p1525_p5 = pnand %p1524_p4, %p1518_p1 }
  0x64   :  { %1528 = shalt.err (!%p1525_p5)
}
  0x65   :  { %94 = dma.hbm_to_vmem [thread:$0]  %s1739_s7, 1024, %s89_s11, [#allocation13], %s1562_s19, %s1562_s19, %s1563_s20  }
  0x66   :  { %1551 = dma.done.wait [#allocation4], 768  }
  0x67   :  { %1552 = vsyncadd [#allocation4], 4294966528 }
  0x68   :  { %1553 = dma.done.wait [#allocation7], 6272  }
  0x69   :  { %1554 = vsyncadd [#allocation7], 4294961024 }
  0x6a   :  { %1555 = dma.done.wait [#allocation10], 2048  }
  0x6b   :  { %1556 = vsyncadd [#allocation10], 4294965248 }
  0x6c   :  { %1557 = dma.done.wait [#allocation13], 1024  }
  0x6d   :  { %1558 = vsyncadd [#allocation13], 4294966272  ;;  %v1316_v0 = vld [vmem:[#allocation6 + $0x40] sm:$0xff]   ;;  %v1320_v4 = vld [vmem:[#allocation6 + $0x48] sm:$0xff]  }
  0x6e   :  { %v1317_v1 = vld [vmem:[#allocation6 + $0xc0] sm:$0xff]   ;;  %1150 = vmatprep.subr.bf16.mxu0 %v1316_v0  ;;  %v1321_v5 = vld [vmem:[#allocation6 + $0xc8] sm:$0xff]   ;;  %v1324_v8 = vld [vmem:[#allocation6 + $0x50] sm:$0xff]  }
  0x6f   :  { %v1318_v2 = vld [vmem:[#allocation6] sm:$0xff]   ;;  %1172 = vmatprep.subr.bf16.mxu1 %v1317_v1  ;;  %v1322_v6 = vld [vmem:[#allocation6 + $0x8] sm:$0xff]   ;;  %v1325_v9 = vld [vmem:[#allocation6 + $0xd0] sm:$0xff]  }
  0x70   :  { %v1319_v3 = vld [vmem:[#allocation6 + $0x80] sm:$0xff]   ;;  %1151 = vmatpush3.bf16.msra.mxu0 %v1318_v2  ;;  %v1323_v7 = vld [vmem:[#allocation6 + $0x88] sm:$0xff]   ;;  %v1326_v10 = vld [vmem:[#allocation6 + $0x10] sm:$0xff]  }
  0x71   :  { %1173 = vmatpush3.bf16.msra.mxu1 %v1319_v3  ;;  %1152 = vmatprep.subr.bf16.mxu0 %v1320_v4  ;;  %v1327_v11 = vld [vmem:[#allocation6 + $0x90] sm:$0xff]   ;;  %v1328_v12 = vld [vmem:[#allocation6 + $0x58] sm:$0xff]   ;;  %v1332_v16 = vld [vmem:[#allocation6 + $0x60] sm:$0xff]  }
  0x72   :  { %1174 = vmatprep.subr.bf16.mxu1 %v1321_v5  ;;  %v1329_v13 = vld [vmem:[#allocation6 + $0xd8] sm:$0xff]   ;;  %v1333_v17 = vld [vmem:[#allocation6 + $0xe0] sm:$0xff]   ;;  %v1336_v20 = vld [vmem:[#allocation6 + $0x68] sm:$0xff]  }
  0x73   :  { %v1330_v14 = vld [vmem:[#allocation6 + $0x18] sm:$0xff]   ;;  %v1334_v18 = vld [vmem:[#allocation6 + $0x20] sm:$0xff]   ;;  %v1337_v21 = vld [vmem:[#allocation6 + $0xe8] sm:$0xff]  }
  0x74   :  { %1153 = vmatpush3.bf16.msra.mxu0 %v1322_v6  ;;  %v1331_v15 = vld [vmem:[#allocation6 + $0x98] sm:$0xff]   ;;  %v1335_v19 = vld [vmem:[#allocation6 + $0xa0] sm:$0xff]   ;;  %v1338_v22 = vld [vmem:[#allocation6 + $0x28] sm:$0xff]  }
  0x75   :  { %1175 = vmatpush3.bf16.msra.mxu1 %v1323_v7  ;;  %1154 = vmatprep.subr.bf16.mxu0 %v1324_v8  ;;  %v1339_v23 = vld [vmem:[#allocation6 + $0xa8] sm:$0xff]   ;;  %v1340_v24 = vld [vmem:[#allocation6 + $0x70] sm:$0xff]   ;;  %v1344_v28 = vld [vmem:[#allocation6 + $0x78] sm:$0xff]  }
  0x76   :  { %1176 = vmatprep.subr.bf16.mxu1 %v1325_v9  ;;  %v1341_v25 = vld [vmem:[#allocation6 + $0xf0] sm:$0xff]   ;;  %v1345_v29 = vld [vmem:[#allocation6 + $0xf8] sm:$0xff]   ;;  %v1354_v36 = vld [vmem:[#allocation6 + $0x140] sm:$0xff]  }
  0x77   :  { %v1342_v26 = vld [vmem:[#allocation6 + $0x30] sm:$0xff]   ;;  %v1346_v30 = vld [vmem:[#allocation6 + $0x38] sm:$0xff]   ;;  %v1355_v37 = vld [vmem:[#allocation6 + $0x100] sm:$0xff]  }
  0x78   :  { %1155 = vmatpush3.bf16.msra.mxu0 %v1326_v10  ;;  %v1343_v27 = vld [vmem:[#allocation6 + $0xb0] sm:$0xff]   ;;  %v1347_v31 = vld [vmem:[#allocation6 + $0xb8] sm:$0xff]   ;;  %v1356_v38 = vld [vmem:[#allocation6 + $0x148] sm:$0xff]  }
  0x79   :  { %1177 = vmatpush3.bf16.msra.mxu1 %v1327_v11  ;;  %1156 = vmatprep.subr.bf16.mxu0 %v1328_v12  ;;  %v1348_v32 = vld [vmem:[#allocation3] ss:$24 sps:$4 sm:$0xff]   ;;  %v1350_v33 = vld [vmem:[#allocation3 + $0x4] ss:$24 sps:$4 sm:$0xff]   ;;  %v1360_v42 = vld [vmem:[#allocation6 + $0x158] sm:$0xff]  }
  0x7a   :  { %1178 = vmatprep.subr.bf16.mxu1 %v1329_v13  ;;  %v1351_v34 = vld [vmem:[#allocation3 + $0x8] ss:$24 sps:$4 sm:$0xff]   ;;  %v1353_v35 = vld [vmem:[#allocation3 + $0xc] ss:$24 sps:$4 sm:$0xff]   ;;  %581 = vmatprep.mubr.bf16.mxu0 %v1350_v33  ;;  %v1357_v39 = vld [vmem:[#allocation6 + $0x108] sm:$0xff]  }
  0x7b   :  { %622 = vmatprep.mubr.bf16.mxu1 %v1353_v35  ;;  %v1358_v40 = vld [vmem:[#allocation6 + $0x150] sm:$0xff]   ;;  %v1361_v43 = vld [vmem:[#allocation6 + $0x118] sm:$0xff]   ;;  %v1362_v44 = vld [vmem:[#allocation6 + $0x160] sm:$0xff]  }
  0x7c   :  { %1157 = vmatpush3.bf16.msra.mxu0 %v1330_v14  ;;  %v1359_v41 = vld [vmem:[#allocation6 + $0x110] sm:$0xff]   ;;  %v1363_v45 = vld [vmem:[#allocation6 + $0x120] sm:$0xff]   ;;  %v1364_v46 = vld [vmem:[#allocation6 + $0x168] sm:$0xff]  }
  0x7d   :  { %1179 = vmatpush3.bf16.msra.mxu1 %v1331_v15  ;;  %1158 = vmatprep.subr.bf16.mxu0 %v1332_v16  ;;  %v1372_v47 = vld [vmem:[#allocation3 + $0x14] ss:$24 sps:$4 sm:$0xff]   ;;  %v1365_v48 = vld [vmem:[#allocation6 + $0x128] sm:$0xff]   ;;  %v1366_v49 = vld [vmem:[#allocation6 + $0x170] sm:$0xff]  }
  0x7e   :  { %1180 = vmatprep.subr.bf16.mxu1 %v1333_v17  ;;  %v1367_v50 = vld [vmem:[#allocation6 + $0x130] sm:$0xff]   ;;  %v1368_v51 = vld [vmem:[#allocation6 + $0x178] sm:$0xff]   ;;  %v1373_v54 = vld [vmem:[#allocation9] sm:$0xff]  }
  0x7f   :  { %v1369_v52 = vld [vmem:[#allocation6 + $0x138] sm:$0xff]   ;;  %v1374_v55 = vld [vmem:[#allocation9 + $0x8] sm:$0xff]   ;;  %v1376_v57 = vld [vmem:[#allocation9 + $0x18] sm:$0xff]  }
  0x80   :  { %1159 = vmatpush3.bf16.msra.mxu0 %v1334_v18  ;;  %v1370_v53 = vld [vmem:[#allocation3 + $0x10] ss:$24 sps:$4 sm:$0xff]   ;;  %v1377_v58 = vld [vmem:[#allocation9 + $0x20] sm:$0xff]   ;;  %v1378_v59 = vld [vmem:[#allocation9 + $0x28] sm:$0xff]  }
  0x81   :  { %1181 = vmatpush3.bf16.msra.mxu1 %v1335_v19  ;;  %1160 = vmatprep.subr.bf16.mxu0 %v1336_v20  ;;  %v1375_v56 = vld [vmem:[#allocation9 + $0x10] sm:$0xff]   ;;  %v1380_v61 = vld [vmem:[#allocation9 + $0x38] sm:$0xff]   ;;  %v1381_v62 = vld [vmem:[#allocation11] sm:$0xff]  }
  0x82   :  { %1182 = vmatprep.subr.bf16.mxu1 %v1337_v21  ;;  %v1379_v60 = vld [vmem:[#allocation9 + $0x30] sm:$0xff]   ;;  %v1382_v63 = vld [vmem:[#allocation11 + $0x8] sm:$0xff]   ;;  %v1384_v1 = vld [vmem:[#allocation11 + $0x18] sm:$0xff]  }
  0x83   :  { %v1383_v0 = vld [vmem:[#allocation11 + $0x10] sm:$0xff]   ;;  %v1385_v2 = vld [vmem:[#allocation11 + $0x20] sm:$0xff]   ;;  %v1386_v3 = vld [vmem:[#allocation11 + $0x28] sm:$0xff]  }
  0x84   :  { %1161 = vmatpush3.bf16.msra.mxu0 %v1338_v22  ;;  %v1147_v18 = vld [vmem:[#allocation8] sm:$0xff]   ;;  %v1387_v35 = vld [vmem:[#allocation11 + $0x30] sm:$0xff]  }
  0x85   :  { %1183 = vmatpush3.bf16.msra.mxu1 %v1339_v23  ;;  %1162 = vmatprep.subr.bf16.mxu0 %v1340_v24  ;;  %v1148_v22 = vunpack.c.l.bf16 %v1147_v18 }
  0x86   :  { %1184 = vmatprep.subr.bf16.mxu1 %v1341_v25 }
  0x88   :  { %1163 = vmatpush3.bf16.msra.mxu0 %v1342_v26 }
  0x89   :  { %1185 = vmatpush3.bf16.msra.mxu1 %v1343_v27  ;;  %1164 = vmatprep.subr.bf16.mxu0 %v1344_v28  ;;  %v1149_v27 = vunpack.c.h.bf16 %v1147_v18 }
  0x8a   :  { %1186 = vmatprep.subr.bf16.mxu1 %v1345_v29 }
  0x8c   :  { %1165 = vmatpush3.bf16.msra.mxu0 %v1346_v30 }
  0x8d   :  { %1187 = vmatpush3.bf16.msra.mxu1 %v1347_v31  ;;  %1194 = vmatprep.subr.bf16.mxu0 %v1354_v36  ;;  %v1388_v36 = vld [vmem:[#allocation11 + $0x38] sm:$0xff]  }
  0x8e   :  { %1246 = vmatprep.subr.bf16.mxu1 %v1373_v54 }
  0x8f   :  { %582 = vmatmul.mubr.bf16.vlgmr.msra.gmra.mrb[0].mxu0 %v1348_v32 }
  0x90   :  { %623 = vmatmul.mubr.bf16.vlgmr.msra.gmra.mrb[0].mxu1 %v1351_v34  ;;  %1195 = vmatpush3.bf16.msra.mxu0 %v1355_v37  ;;  %v1389_v37 = vld [vmem:[#allocation12] sm:$0xff]  }
  0x91   :  { %1196 = vmatprep.subr.bf16.mxu0 %v1356_v38  ;;  %663 = vmatprep.mubr.bf16.mxu0 %v1372_v47  ;;  %v1390_v38 = vld [vmem:[#allocation12 + $0x8] sm:$0xff]  }
  0x92   :  { %1247 = vmatpush3.bf16.msra.mxu1 %v1373_v54 }
  0x93   :  { %1248 = vmatprep.subr.bf16.mxu1 %v1374_v55 }
  0x94   :  { %1197 = vmatpush3.bf16.msra.mxu0 %v1357_v39  ;;  %v1391_v39 = vld [vmem:[#allocation12 + $0x10] sm:$0xff]  }
  0x95   :  { %1198 = vmatprep.subr.bf16.mxu0 %v1358_v40  ;;  %v1392_v40 = vld [vmem:[#allocation12 + $0x18] sm:$0xff]  }
  0x96   :  { %1249 = vmatpush3.bf16.msra.mxu1 %v1374_v55 }
  0x97   :  { %1250 = vmatprep.subr.bf16.mxu1 %v1375_v56 }
  0x98   :  { %1199 = vmatpush3.bf16.msra.mxu0 %v1359_v41  ;;  %v1393_v41 = vld [vmem:[#allocation12 + $0x20] sm:$0xff]  }
  0x99   :  { %1200 = vmatprep.subr.bf16.mxu0 %v1360_v42  ;;  %v1394_v42 = vld [vmem:[#allocation12 + $0x28] sm:$0xff]  }
  0x9a   :  { %1251 = vmatpush3.bf16.msra.mxu1 %v1375_v56 }
  0x9b   :  { %1252 = vmatprep.subr.bf16.mxu1 %v1376_v57 }
  0x9c   :  { %1201 = vmatpush3.bf16.msra.mxu0 %v1361_v43  ;;  %v711_v43 = vlaneseq }
  0x9d   :  { %1202 = vmatprep.subr.bf16.mxu0 %v1362_v44 }
  0x9e   :  { %1253 = vmatpush3.bf16.msra.mxu1 %v1376_v57  ;;  %v712_v44 = vshrl.u32 %v711_v43, 7  ;;  %v1395_v57 = vld [vmem:[#allocation12 + $0x30] sm:$0xff]  }
  0x9f   :  { %1254 = vmatprep.subr.bf16.mxu1 %v1377_v58 }
  0xa0   :  { %1203 = vmatpush3.bf16.msra.mxu0 %v1363_v45  ;;  %v709_v45 = vld [vmem:[%s1736_s4] sm:$0x1]  ;;  %v713_v47 = vsub.s32 0, %v712_v44 }
  0xa1   :  { %1204 = vmatprep.subr.bf16.mxu0 %v1364_v46  ;;  %v710_v46 = vunpack.c.l.bf16 %v709_v45 }
  0xa2   :  { %1255 = vmatpush3.bf16.msra.mxu1 %v1377_v58  ;;  %v1396_v58 = vld [vmem:[#allocation12 + $0x38] sm:$0xff]  }
  0xa3   :  { %1256 = vmatprep.subr.bf16.mxu1 %v1378_v59 }
  0xa4   :  { %1205 = vmatpush3.bf16.msra.mxu0 %v1365_v48  ;;  %v714_v48 = vrot.slane %v710_v46, %v713_v47 }
  0xa5   :  { %1206 = vmatprep.subr.bf16.mxu0 %v1366_v49 }
  0xa6   :  { %1257 = vmatpush3.bf16.msra.mxu1 %v1378_v59  ;;  %v828_v59 = vld [vmem:[%s1738_s6] sm:$0x1]  ;;  %s1571_s6 = smov [#allocation14]  }
  0xa7   :  { %1258 = vmatprep.subr.bf16.mxu1 %v1379_v60  ;;  %s1051_s21 = sshll.u32 %s1571_s6, 4  ;;  %s1052_s21 = int_to_ptr.vmem [resolvable:$true] %s1051_s21 }
  0xa8   :  { %1207 = vmatpush3.bf16.msra.mxu0 %v1367_v50  ;;  %s1529_s22 = scalar_lea.vmem %s1052_s21, 256  ;;  %p1534_p7 = scmp.lt.s32.totalorder %s1052_s21, %s1052_s21 }
  0xa9   :  { %1208 = vmatprep.subr.bf16.mxu0 %v1368_v51  ;;  %p1530_p6 = scmp.ne.s32.totalorder %s1052_s21, %s1529_s22  ;;  %p1535_p8 = scmp.lt.s32.totalorder %s1529_s22, %s1529_s22 }
  0xaa   :  { %1259 = vmatpush3.bf16.msra.mxu1 %v1379_v60  ;;  %v829_v60 = vunpack.c.l.bf16 %v828_v59 }
  0xab   :  { %1260 = vmatprep.subr.bf16.mxu1 %v1380_v61  ;;  %p1536_p9 = por %p1535_p8, %p1534_p7 }
  0xac   :  { %1209 = vmatpush3.bf16.msra.mxu0 %v1369_v52 }
  0xad   :  { %1265 = vmatprep.subr.bf16.mxu0 %v1381_v62  ;;  %p1537_p10 = pnand %p1536_p9, %p1530_p6 }
  0xae   :  { %1261 = vmatpush3.bf16.msra.mxu1 %v1380_v61  ;;  %v833_v61 = vrot.slane %v829_v60, %v713_v47 }
  0xaf   :  { %664 = vmatmul.mubr.bf16.vlgmr.msra.gmra.mrb[4].mxu0 %v1370_v53  ;;  %1284 = vmatprep.subr.bf16.mxu1 %v1389_v37 }
  0xb0   :  { %1266 = vmatpush3.bf16.msra.mxu0 %v1381_v62 }
  0xb1   :  { %1267 = vmatprep.subr.bf16.mxu0 %v1382_v63 }
  0xb4   :  { %1268 = vmatpush3.bf16.msra.mxu0 %v1382_v63 }
  0xb5   :  { %1269 = vmatprep.subr.bf16.mxu0 %v1383_v0 }
  0xb8   :  { %1270 = vmatpush3.bf16.msra.mxu0 %v1383_v0 }
  0xb9   :  { %1271 = vmatprep.subr.bf16.mxu0 %v1384_v1 }
  0xbc   :  { %1272 = vmatpush3.bf16.msra.mxu0 %v1384_v1 }
  0xbd   :  { %1273 = vmatprep.subr.bf16.mxu0 %v1385_v2 }
  0xc0   :  { %1274 = vmatpush3.bf16.msra.mxu0 %v1385_v2 }
  0xc1   :  { %1275 = vmatprep.subr.bf16.mxu0 %v1386_v3 }
  0xc4   :  { %1276 = vmatpush3.bf16.msra.mxu0 %v1386_v3 }
  0xc5   :  { %1277 = vmatprep.subr.bf16.mxu0 %v1387_v35 }
  0xc8   :  { %1278 = vmatpush3.bf16.msra.mxu0 %v1387_v35 }
  0xc9   :  { %1279 = vmatprep.subr.bf16.mxu0 %v1388_v36 }
  0xcc   :  { %1280 = vmatpush3.bf16.msra.mxu0 %v1388_v36 }
 0x162   :  { %v1166_v4 = vpop.f32.mrb[0].mxu0 }
 0x163   :  { %v1188_v5 = vpop.f32.mrb[0].mxu1  ;;  %v1167_v6 = vpop.f32.mrb[1].mxu0 }
 0x164   :  { %v1168_v7 = vadd.f32 %v1167_v6, %v1166_v4  ;;  %v1189_v8 = vpop.f32.mrb[1].mxu1  ;;  %v1169_v9 = vpop.f32.mrb[2].mxu0  ;;  %v947_v6 = vld [vmem:[%s1740_s8] sm:$0x1] }
 0x165   :  { %v1190_v10 = vadd.f32 %v1189_v8, %v1188_v5  ;;  %v1191_v11 = vpop.f32.mrb[2].mxu1  ;;  %v1170_v12 = vpop.f32.mrb[3].mxu0 }
 0x166   :  { %v1171_v13 = vadd.f32 %v1170_v12, %v1169_v9  ;;  %v1192_v14 = vpop.f32.mrb[3].mxu1 }
 0x167   :  { %v625_v15 = vadd.f32 %v1190_v10, %v1168_v7  ;;  %v1193_v16 = vadd.f32 %v1192_v14, %v1191_v11  ;;  %v948_v7 = vunpack.c.l.bf16 %v947_v6 }
 0x169   :  { %v628_v17 = vadd.f32 %v1193_v16, %v1171_v13  ;;  %v952_v8 = vrot.slane %v948_v7, %v713_v47 }
 0x182   :  { %v1210_v19 = vpop.f32.mrb[4].mxu0 }
 0x183   :  { %v1211_v20 = vpop.f32.mrb[5].mxu0 }
 0x184   :  { %v1212_v21 = vadd.f32 %v1211_v20, %v1210_v19  ;;  %v1213_v23 = vpop.f32.mrb[6].mxu0 }
 0x185   :  { %v1214_v24 = vpop.f32.mrb[7].mxu0 }
 0x186   :  { %v666_v25 = vadd.f32 %v1212_v21, %v625_v15  ;;  %v1215_v26 = vadd.f32 %v1214_v24, %v1213_v23 }
 0x188   :  { %v685_v28 = vadd.f32 %v1148_v22, %v666_v25  ;;  %v669_v29 = vadd.f32 %v1215_v26, %v628_v17 }
 0x18a   :  { %v686_v30 = vadd.f32 %v1149_v27, %v669_v29  ;;  %vm687_vm0 = vcmp.gt.f32.partialorder %v685_v28, 0.0  ;;  %v689_v31 = vmul.f32 0.2, %v685_v28 }
 0x18c   :  { %v691_v32 = vsel %vm687_vm0, %v685_v28, %v689_v31  ;;  %vm688_vm1 = vcmp.gt.f32.partialorder %v686_v30, 0.0  ;;  %v690_v33 = vmul.f32 0.2, %v686_v30 }
 0x18d   :  { %1262 = vmatprep.mubr.f32.mxu1 %v691_v32 }
 0x18e   :  { %v692_v34 = vsel %vm688_vm1, %v686_v30, %v690_v33 }
 0x18f   :  { %1263 = vmatmul.mubr.f32.vlgmr.msra.gmra.mrb[4].mxu1 %v692_v34 }
 0x190   :  { %1285 = vmatpush3.bf16.msra.mxu1 %v1389_v37 }
 0x191   :  { %1286 = vmatprep.subr.bf16.mxu1 %v1390_v38 }
 0x194   :  { %1287 = vmatpush3.bf16.msra.mxu1 %v1390_v38 }
 0x195   :  { %1288 = vmatprep.subr.bf16.mxu1 %v1391_v39 }
 0x198   :  { %1289 = vmatpush3.bf16.msra.mxu1 %v1391_v39 }
 0x199   :  { %1290 = vmatprep.subr.bf16.mxu1 %v1392_v40 }
 0x19c   :  { %1291 = vmatpush3.bf16.msra.mxu1 %v1392_v40 }
 0x19d   :  { %1292 = vmatprep.subr.bf16.mxu1 %v1393_v41 }
 0x1a0   :  { %1293 = vmatpush3.bf16.msra.mxu1 %v1393_v41 }
 0x1a1   :  { %1294 = vmatprep.subr.bf16.mxu1 %v1394_v42 }
 0x1a4   :  { %1295 = vmatpush3.bf16.msra.mxu1 %v1394_v42 }
 0x1a5   :  { %1296 = vmatprep.subr.bf16.mxu1 %v1395_v57 }
 0x1a8   :  { %1297 = vmatpush3.bf16.msra.mxu1 %v1395_v57 }
 0x1a9   :  { %1298 = vmatprep.subr.bf16.mxu1 %v1396_v58 }
 0x1ac   :  { %1299 = vmatpush3.bf16.msra.mxu1 %v1396_v58 }
 0x262   :  { %v1264_v49 = vpop.f32.mrb[4].mxu1 }
 0x263   :  { %v803_v50 = vadd.f32 %v1264_v49, %v714_v48  ;;  %v797_v51 = vpop.f32.mrb[5].mxu1 }
 0x264   :  { %v798_v52 = vadd.f32 %v797_v51, %v714_v48 }
 0x265   :  { %v809_v53 = vmul.f32 0.2, %v803_v50  ;;  %vm807_vm2 = vcmp.gt.f32.partialorder %v803_v50, 0.0 }
 0x266   :  { %v808_v54 = vmul.f32 0.2, %v798_v52  ;;  %vm806_vm3 = vcmp.gt.f32.partialorder %v798_v52, 0.0 }
 0x267   :  { %v811_v56 = vsel %vm807_vm2, %v803_v50, %v809_v53 }
 0x268   :  { %v810_v55 = vsel %vm806_vm3, %v798_v52, %v808_v54 }
 0x269   :  { %1281 = vmatprep.mubr.f32.mxu0 %v810_v55 }
 0x26a   :  { %1282 = vmatmul.mubr.f32.vlgmr.msra.gmra.mrb[8].mxu0 %v811_v56 }
 0x33d   :  { %v1283_v62 = vpop.f32.mrb[8].mxu0 }
 0x33e   :  { %v922_v63 = vadd.f32 %v1283_v62, %v833_v61  ;;  %v916_v0 = vpop.f32.mrb[9].mxu0 }
 0x33f   :  { %v917_v1 = vadd.f32 %v916_v0, %v833_v61 }
 0x340   :  { %v928_v2 = vmul.f32 0.2, %v922_v63  ;;  %vm926_vm4 = vcmp.gt.f32.partialorder %v922_v63, 0.0 }
 0x341   :  { %v927_v3 = vmul.f32 0.2, %v917_v1  ;;  %vm925_vm5 = vcmp.gt.f32.partialorder %v917_v1, 0.0 }
 0x342   :  { %v930_v5 = vsel %vm926_vm4, %v922_v63, %v928_v2 }
 0x343   :  { %v929_v4 = vsel %vm925_vm5, %v917_v1, %v927_v3 }
 0x344   :  { %1300 = vmatprep.mubr.f32.mxu1 %v929_v4 }
 0x345   :  { %1301 = vmatmul.mubr.f32.vlgmr.msra.gmra.mrb[6].mxu1 %v930_v5 }
 0x418   :  { %v1302_v9 = vpop.f32.mrb[6].mxu1 }
 0x419   :  { %v1041_v10 = vadd.f32 %v1302_v9, %v952_v8  ;;  %v1035_v11 = vpop.f32.mrb[7].mxu1 }
 0x41a   :  { %v1036_v12 = vadd.f32 %v1035_v11, %v952_v8 }
 0x41b   :  { %1045 = vst [vmem:[#allocation14 + $0x8] sm:$0xff] %v1041_v10 }
 0x41c   :  { %1044 = vst [vmem:[#allocation14] sm:$0xff] %v1036_v12 }
 0x41d   :  { %1540 = shalt.err (!%p1537_p10)
}
 0x41e   :  { %s1541_s25 = scalar_lea.hbm %s1741_s9, 256 }
 0x41f   :  { %p1542_p11 = scmp.ne.s32.totalorder %s1741_s9, %s1541_s25  ;;  %p1545_p12 = scmp.lt.u32.totalorder %s1541_s25, %s1741_s9 }
 0x421   :  { %p1547_p13 = pnand %p1545_p12, %p1542_p11 }
 0x423   :  { %1550 = shalt.err (!%p1547_p13)
}
 0x424   :  { %s1572_s2 = smov 128   ;;  %s1573_s29 = smov 8  }
 0x425   :  { %1057 = dma.vmem_to_hbm [thread:$0]  %s1052_s21, 256, %s1741_s9, [#allocation5], %s1572_s2, %s1572_s2, %s1573_s29  }
 0x426   :  { %1559 = dma.done.wait [#allocation5], 256  }
 0x427   :  { %1560 = vsyncadd [#allocation5], 4294967040 }
 0x428   :  { %1061 = vsyncpa [#allocation4], 1 }
 0x429   :  { %1062 = vsyncpa [#allocation7], 1 }
 0x42a   :  { %1063 = vsyncpa [#allocation10], 1 }
 0x42b   :  { %1064 = vsyncpa [#allocation13], 1 }
 0x42c   :  { %1065 = vsyncpa [#allocation5], 1 }

// kernel: tpu_custom_call.1
= control target key start
LH: loop header
LB: loop body
LE: loop exit
PB: predicated region body
PF: predicated region fallthrough
CT: control target
= control target key end

     0   :  { %14 = vsyncpa [#allocation4], 0  ;;  %s1725_s0 = inlined_call_operand.hbm [shape: bf16[16,768], index: 0, kind: input, shape index: {}]   ;;  %s1726_s1 = inlined_call_operand.hbm [shape: bf16[768,128], index: 1, kind: input, shape index: {}]   ;;  %s1727_s2 = inlined_call_operand.hbm [shape: bf16[16,128], index: 2, kind: input, shape index: {}]   ;;  %s1728_s3 = inlined_call_operand.hbm [shape: bf16[128,128], index: 3, kind: input, shape index: {}]   ;;  %s1729_s4 = inlined_call_operand.vmem [shape: bf16[1,128], index: 4, kind: input, shape index: {}]   ;;  %s1730_s5 = inlined_call_operand.hbm [shape: bf16[128,128], index: 5, kind: input, shape index: {}]   ;;  %s1731_s6 = inlined_call_operand.vmem [shape: bf16[1,128], index: 6, kind: input, shape index: {}]   ;;  %s1732_s7 = inlined_call_operand.hbm [shape: bf16[128,128], index: 7, kind: input, shape index: {}]   ;;  %s1733_s8 = inlined_call_operand.vmem [shape: bf16[1,128], index: 8, kind: input, shape index: {}]   ;;  %s1734_s9 = inlined_call_operand.hbm [shape: f32[16,128], index: 9, kind: output, shape index: {}]  }
   0x1   :  { %15 = vsyncpa [#allocation7], 0 }
   0x2   :  { %16 = vsyncpa [#allocation10], 0 }
   0x3   :  { %17 = vsyncpa [#allocation13], 0 }
   0x4   :  { %18 = vsyncpa [#allocation5], 0  ;;  %s1554_s30 = smov [#allocation6]   ;;  %s1390_s13 = scalar_lea.hbm %s1726_s1, 6144 }
   0x5   :  { %s36_s10 = sshll.u32 %s1554_s30, 4  ;;  %p1391_p0 = scmp.ne.s32.totalorder %s1726_s1, %s1390_s13  ;;  %s37_s10 = int_to_ptr.vmem [resolvable:$true] %s36_s10 }
   0x6   :  { %p1394_p1 = scmp.lt.u32.totalorder %s1390_s13, %s1726_s1 }
   0x8   :  { %p1396_p2 = pnand %p1394_p1, %p1391_p0 }
   0xa   :  { %1399 = shalt.err (!%p1396_p2)
}
   0xb   :  { %s1400_s18 = scalar_lea.vmem %s37_s10, 6144  ;;  %p1405_p4 = scmp.lt.s32.totalorder %s37_s10, %s37_s10 }
   0xc   :  { %p1401_p3 = scmp.ne.s32.totalorder %s37_s10, %s1400_s18  ;;  %p1406_p5 = scmp.lt.s32.totalorder %s1400_s18, %s1400_s18 }
   0xe   :  { %p1407_p6 = por %p1406_p5, %p1405_p4 }
  0x10   :  { %p1408_p7 = pnand %p1407_p6, %p1401_p3 }
  0x12   :  { %1411 = shalt.err (!%p1408_p7)
}
  0x13   :  { %s1555_s19 = smov 64   ;;  %s1556_s20 = smov 4  }
  0x14   :  { %42 = dma.hbm_to_vmem [thread:$0]  %s1726_s1, 6144, %s37_s10, [#allocation7], %s1555_s19, %s1555_s19, %s1556_s20  }
  0x15   :  { %s1557_s23 = smov [#allocation9]   ;;  %s1558_s25 = smov [#allocation3]  }
  0x16   :  { %s60_s24 = sshll.u32 %s1557_s23, 4  ;;  %s24_s26 = sshll.u32 %s1558_s25, 4  ;;  %s61_s24 = int_to_ptr.vmem [resolvable:$true] %s60_s24  ;;  %s25_s26 = int_to_ptr.vmem [resolvable:$true] %s24_s26 }
  0x17   :  { %s1412_s29 = scalar_lea.hbm %s1728_s3, 1024 }
  0x18   :  { %p1413_p8 = scmp.ne.s32.totalorder %s1728_s3, %s1412_s29  ;;  %p1416_p9 = scmp.lt.u32.totalorder %s1412_s29, %s1728_s3 }
  0x1a   :  { %p1418_p10 = pnand %p1416_p9, %p1413_p8 }
  0x1c   :  { %1421 = shalt.err (!%p1418_p10)
}
  0x1d   :  { %s1422_s1 = scalar_lea.vmem %s61_s24, 1024  ;;  %p1427_p12 = scmp.lt.s32.totalorder %s61_s24, %s61_s24 }
  0x1e   :  { %p1423_p11 = scmp.ne.s32.totalorder %s61_s24, %s1422_s1  ;;  %p1428_p13 = scmp.lt.s32.totalorder %s1422_s1, %s1422_s1 }
  0x20   :  { %p1429_p0 = por %p1428_p13, %p1427_p12 }
  0x22   :  { %p1430_p1 = pnand %p1429_p0, %p1423_p11 }
  0x24   :  { %1433 = shalt.err (!%p1430_p1)
}
  0x25   :  { %66 = dma.hbm_to_vmem [thread:$0]  %s1728_s3, 1024, %s61_s24, [#allocation10], %s1555_s19, %s1555_s19, %s1556_s20  }
  0x26   :  { %s1434_s17 = scalar_lea.hbm %s1725_s0, 768 }
  0x27   :  { %p1435_p2 = scmp.ne.s32.totalorder %s1725_s0, %s1434_s17  ;;  %p1438_p3 = scmp.lt.u32.totalorder %s1434_s17, %s1725_s0 }
  0x29   :  { %p1440_p4 = pnand %p1438_p3, %p1435_p2 }
  0x2b   :  { %1443 = shalt.err (!%p1440_p4)
}
  0x2c   :  { %s1444_s25 = scalar_lea.vmem %s25_s26, 768  ;;  %p1449_p6 = scmp.lt.s32.totalorder %s25_s26, %s25_s26 }
  0x2d   :  { %p1445_p5 = scmp.ne.s32.totalorder %s25_s26, %s1444_s25  ;;  %p1450_p7 = scmp.lt.s32.totalorder %s1444_s25, %s1444_s25 }
  0x2f   :  { %p1451_p8 = por %p1450_p7, %p1449_p6 }
  0x31   :  { %p1452_p9 = pnand %p1451_p8, %p1445_p5 }
  0x33   :  { %1455 = shalt.err (!%p1452_p9)
}
  0x34   :  { %s1559_s3 = smov 384   ;;  %s1560_s24 = smov 24  }
  0x35   :  { %30 = dma.hbm_to_vmem [thread:$0]  %s1725_s0, 768, %s25_s26, [#allocation4], %s1559_s3, %s1559_s3, %s1560_s24  }
  0x36   :  { %s1561_s29 = smov [#allocation8]   ;;  %s1562_s11 = smov [#allocation11]  }
  0x37   :  { %s48_s30 = sshll.u32 %s1561_s29, 4  ;;  %s74_s12 = sshll.u32 %s1562_s11, 4  ;;  %s49_s30 = int_to_ptr.vmem [resolvable:$true] %s48_s30  ;;  %s75_s12 = int_to_ptr.vmem [resolvable:$true] %s74_s12 }
  0x38   :  { %s1456_s10 = scalar_lea.hbm %s1727_s2, 128 }
  0x39   :  { %p1457_p10 = scmp.ne.s32.totalorder %s1727_s2, %s1456_s10  ;;  %p1460_p11 = scmp.lt.u32.totalorder %s1456_s10, %s1727_s2 }
  0x3b   :  { %p1462_p12 = pnand %p1460_p11, %p1457_p10 }
  0x3d   :  { %1465 = shalt.err (!%p1462_p12)
}
  0x3e   :  { %s1466_s0 = scalar_lea.vmem %s49_s30, 128  ;;  %p1471_p0 = scmp.lt.s32.totalorder %s49_s30, %s49_s30 }
  0x3f   :  { %p1467_p13 = scmp.ne.s32.totalorder %s49_s30, %s1466_s0  ;;  %p1472_p1 = scmp.lt.s32.totalorder %s1466_s0, %s1466_s0 }
  0x41   :  { %p1473_p2 = por %p1472_p1, %p1471_p0 }
  0x43   :  { %p1474_p3 = pnand %p1473_p2, %p1467_p13 }
  0x45   :  { %1477 = shalt.err (!%p1474_p3)
}
  0x46   :  { %54 = dma.hbm_to_vmem [thread:$0]  %s1727_s2, 128, %s49_s30, [#allocation7], %s1555_s19, %s1555_s19, %s1556_s20  }
  0x47   :  { %s1478_s23 = scalar_lea.hbm %s1730_s5, 1024 }
  0x48   :  { %p1479_p4 = scmp.ne.s32.totalorder %s1730_s5, %s1478_s23  ;;  %p1482_p5 = scmp.lt.u32.totalorder %s1478_s23, %s1730_s5 }
  0x4a   :  { %p1484_p6 = pnand %p1482_p5, %p1479_p4 }
  0x4c   :  { %1487 = shalt.err (!%p1484_p6)
}
  0x4d   :  { %s1488_s28 = scalar_lea.vmem %s75_s12, 1024  ;;  %p1493_p8 = scmp.lt.s32.totalorder %s75_s12, %s75_s12 }
  0x4e   :  { %p1489_p7 = scmp.ne.s32.totalorder %s75_s12, %s1488_s28  ;;  %p1494_p9 = scmp.lt.s32.totalorder %s1488_s28, %s1488_s28 }
  0x50   :  { %p1495_p10 = por %p1494_p9, %p1493_p8 }
  0x52   :  { %p1496_p11 = pnand %p1495_p10, %p1489_p7 }
  0x54   :  { %1499 = shalt.err (!%p1496_p11)
}
  0x55   :  { %80 = dma.hbm_to_vmem [thread:$0]  %s1730_s5, 1024, %s75_s12, [#allocation10], %s1555_s19, %s1555_s19, %s1556_s20  }
  0x56   :  { %s1563_s30 = smov [#allocation12]   ;;  %s1500_s10 = scalar_lea.hbm %s1732_s7, 1024 }
  0x57   :  { %s88_s11 = sshll.u32 %s1563_s30, 4  ;;  %p1501_p12 = scmp.ne.s32.totalorder %s1732_s7, %s1500_s10  ;;  %s89_s11 = int_to_ptr.vmem [resolvable:$true] %s88_s11 }
  0x58   :  { %p1504_p13 = scmp.lt.u32.totalorder %s1500_s10, %s1732_s7 }
  0x5a   :  { %p1506_p0 = pnand %p1504_p13, %p1501_p12 }
  0x5c   :  { %1509 = shalt.err (!%p1506_p0)
}
  0x5d   :  { %s1510_s0 = scalar_lea.vmem %s89_s11, 1024  ;;  %p1515_p2 = scmp.lt.s32.totalorder %s89_s11, %s89_s11 }
  0x5e   :  { %p1511_p1 = scmp.ne.s32.totalorder %s89_s11, %s1510_s0  ;;  %p1516_p3 = scmp.lt.s32.totalorder %s1510_s0, %s1510_s0 }
  0x60   :  { %p1517_p4 = por %p1516_p3, %p1515_p2 }
  0x62   :  { %p1518_p5 = pnand %p1517_p4, %p1511_p1 }
  0x64   :  { %1521 = shalt.err (!%p1518_p5)
}
  0x65   :  { %94 = dma.hbm_to_vmem [thread:$0]  %s1732_s7, 1024, %s89_s11, [#allocation13], %s1555_s19, %s1555_s19, %s1556_s20  }
  0x66   :  { %1544 = dma.done.wait [#allocation4], 768  }
  0x67   :  { %1545 = vsyncadd [#allocation4], 4294966528 }
  0x68   :  { %1546 = dma.done.wait [#allocation7], 6272  }
  0x69   :  { %1547 = vsyncadd [#allocation7], 4294961024 }
  0x6a   :  { %1548 = dma.done.wait [#allocation10], 2048  }
  0x6b   :  { %1549 = vsyncadd [#allocation10], 4294965248 }
  0x6c   :  { %1550 = dma.done.wait [#allocation13], 1024  }
  0x6d   :  { %1551 = vsyncadd [#allocation13], 4294966272  ;;  %v1309_v0 = vld [vmem:[#allocation6 + $0x40] sm:$0xff]   ;;  %v1313_v4 = vld [vmem:[#allocation6 + $0x48] sm:$0xff]  }
  0x6e   :  { %v1310_v1 = vld [vmem:[#allocation6 + $0xc0] sm:$0xff]   ;;  %1143 = vmatprep.subr.bf16.mxu0 %v1309_v0  ;;  %v1314_v5 = vld [vmem:[#allocation6 + $0xc8] sm:$0xff]   ;;  %v1317_v8 = vld [vmem:[#allocation6 + $0x50] sm:$0xff]  }
  0x6f   :  { %v1311_v2 = vld [vmem:[#allocation6] sm:$0xff]   ;;  %1165 = vmatprep.subr.bf16.mxu1 %v1310_v1  ;;  %v1315_v6 = vld [vmem:[#allocation6 + $0x8] sm:$0xff]   ;;  %v1318_v9 = vld [vmem:[#allocation6 + $0xd0] sm:$0xff]  }
  0x70   :  { %v1312_v3 = vld [vmem:[#allocation6 + $0x80] sm:$0xff]   ;;  %1144 = vmatpush3.bf16.msra.mxu0 %v1311_v2  ;;  %v1316_v7 = vld [vmem:[#allocation6 + $0x88] sm:$0xff]   ;;  %v1319_v10 = vld [vmem:[#allocation6 + $0x10] sm:$0xff]  }
  0x71   :  { %1166 = vmatpush3.bf16.msra.mxu1 %v1312_v3  ;;  %1145 = vmatprep.subr.bf16.mxu0 %v1313_v4  ;;  %v1320_v11 = vld [vmem:[#allocation6 + $0x90] sm:$0xff]   ;;  %v1321_v12 = vld [vmem:[#allocation6 + $0x58] sm:$0xff]   ;;  %v1325_v16 = vld [vmem:[#allocation6 + $0x60] sm:$0xff]  }
  0x72   :  { %1167 = vmatprep.subr.bf16.mxu1 %v1314_v5  ;;  %v1322_v13 = vld [vmem:[#allocation6 + $0xd8] sm:$0xff]   ;;  %v1326_v17 = vld [vmem:[#allocation6 + $0xe0] sm:$0xff]   ;;  %v1329_v20 = vld [vmem:[#allocation6 + $0x68] sm:$0xff]  }
  0x73   :  { %v1323_v14 = vld [vmem:[#allocation6 + $0x18] sm:$0xff]   ;;  %v1327_v18 = vld [vmem:[#allocation6 + $0x20] sm:$0xff]   ;;  %v1330_v21 = vld [vmem:[#allocation6 + $0xe8] sm:$0xff]  }
  0x74   :  { %1146 = vmatpush3.bf16.msra.mxu0 %v1315_v6  ;;  %v1324_v15 = vld [vmem:[#allocation6 + $0x98] sm:$0xff]   ;;  %v1328_v19 = vld [vmem:[#allocation6 + $0xa0] sm:$0xff]   ;;  %v1331_v22 = vld [vmem:[#allocation6 + $0x28] sm:$0xff]  }
  0x75   :  { %1168 = vmatpush3.bf16.msra.mxu1 %v1316_v7  ;;  %1147 = vmatprep.subr.bf16.mxu0 %v1317_v8  ;;  %v1332_v23 = vld [vmem:[#allocation6 + $0xa8] sm:$0xff]   ;;  %v1333_v24 = vld [vmem:[#allocation6 + $0x70] sm:$0xff]   ;;  %v1337_v28 = vld [vmem:[#allocation6 + $0x78] sm:$0xff]  }
  0x76   :  { %1169 = vmatprep.subr.bf16.mxu1 %v1318_v9  ;;  %v1334_v25 = vld [vmem:[#allocation6 + $0xf0] sm:$0xff]   ;;  %v1338_v29 = vld [vmem:[#allocation6 + $0xf8] sm:$0xff]   ;;  %v1347_v36 = vld [vmem:[#allocation6 + $0x140] sm:$0xff]  }
  0x77   :  { %v1335_v26 = vld [vmem:[#allocation6 + $0x30] sm:$0xff]   ;;  %v1339_v30 = vld [vmem:[#allocation6 + $0x38] sm:$0xff]   ;;  %v1348_v37 = vld [vmem:[#allocation6 + $0x100] sm:$0xff]  }
  0x78   :  { %1148 = vmatpush3.bf16.msra.mxu0 %v1319_v10  ;;  %v1336_v27 = vld [vmem:[#allocation6 + $0xb0] sm:$0xff]   ;;  %v1340_v31 = vld [vmem:[#allocation6 + $0xb8] sm:$0xff]   ;;  %v1349_v38 = vld [vmem:[#allocation6 + $0x148] sm:$0xff]  }
  0x79   :  { %1170 = vmatpush3.bf16.msra.mxu1 %v1320_v11  ;;  %1149 = vmatprep.subr.bf16.mxu0 %v1321_v12  ;;  %v1341_v32 = vld [vmem:[#allocation3] ss:$24 sps:$4 sm:$0xff]   ;;  %v1343_v33 = vld [vmem:[#allocation3 + $0x4] ss:$24 sps:$4 sm:$0xff]   ;;  %v1353_v42 = vld [vmem:[#allocation6 + $0x158] sm:$0xff]  }
  0x7a   :  { %1171 = vmatprep.subr.bf16.mxu1 %v1322_v13  ;;  %v1344_v34 = vld [vmem:[#allocation3 + $0x8] ss:$24 sps:$4 sm:$0xff]   ;;  %v1346_v35 = vld [vmem:[#allocation3 + $0xc] ss:$24 sps:$4 sm:$0xff]   ;;  %576 = vmatprep.mubr.bf16.mxu0 %v1343_v33  ;;  %v1350_v39 = vld [vmem:[#allocation6 + $0x108] sm:$0xff]  }
  0x7b   :  { %617 = vmatprep.mubr.bf16.mxu1 %v1346_v35  ;;  %v1351_v40 = vld [vmem:[#allocation6 + $0x150] sm:$0xff]   ;;  %v1354_v43 = vld [vmem:[#allocation6 + $0x118] sm:$0xff]   ;;  %v1355_v44 = vld [vmem:[#allocation6 + $0x160] sm:$0xff]  }
  0x7c   :  { %1150 = vmatpush3.bf16.msra.mxu0 %v1323_v14  ;;  %v1352_v41 = vld [vmem:[#allocation6 + $0x110] sm:$0xff]   ;;  %v1356_v45 = vld [vmem:[#allocation6 + $0x120] sm:$0xff]   ;;  %v1357_v46 = vld [vmem:[#allocation6 + $0x168] sm:$0xff]  }
  0x7d   :  { %1172 = vmatpush3.bf16.msra.mxu1 %v1324_v15  ;;  %1151 = vmatprep.subr.bf16.mxu0 %v1325_v16  ;;  %v1365_v47 = vld [vmem:[#allocation3 + $0x14] ss:$24 sps:$4 sm:$0xff]   ;;  %v1358_v48 = vld [vmem:[#allocation6 + $0x128] sm:$0xff]   ;;  %v1359_v49 = vld [vmem:[#allocation6 + $0x170] sm:$0xff]  }
  0x7e   :  { %1173 = vmatprep.subr.bf16.mxu1 %v1326_v17  ;;  %v1360_v50 = vld [vmem:[#allocation6 + $0x130] sm:$0xff]   ;;  %v1361_v51 = vld [vmem:[#allocation6 + $0x178] sm:$0xff]   ;;  %v1366_v54 = vld [vmem:[#allocation9] sm:$0xff]  }
  0x7f   :  { %v1362_v52 = vld [vmem:[#allocation6 + $0x138] sm:$0xff]   ;;  %v1367_v55 = vld [vmem:[#allocation9 + $0x8] sm:$0xff]   ;;  %v1369_v57 = vld [vmem:[#allocation9 + $0x18] sm:$0xff]  }
  0x80   :  { %1152 = vmatpush3.bf16.msra.mxu0 %v1327_v18  ;;  %v1363_v53 = vld [vmem:[#allocation3 + $0x10] ss:$24 sps:$4 sm:$0xff]   ;;  %v1370_v58 = vld [vmem:[#allocation9 + $0x20] sm:$0xff]   ;;  %v1371_v59 = vld [vmem:[#allocation9 + $0x28] sm:$0xff]  }
  0x81   :  { %1174 = vmatpush3.bf16.msra.mxu1 %v1328_v19  ;;  %1153 = vmatprep.subr.bf16.mxu0 %v1329_v20  ;;  %v1368_v56 = vld [vmem:[#allocation9 + $0x10] sm:$0xff]   ;;  %v1373_v61 = vld [vmem:[#allocation9 + $0x38] sm:$0xff]   ;;  %v1374_v62 = vld [vmem:[#allocation11] sm:$0xff]  }
  0x82   :  { %1175 = vmatprep.subr.bf16.mxu1 %v1330_v21  ;;  %v1372_v60 = vld [vmem:[#allocation9 + $0x30] sm:$0xff]   ;;  %v1375_v63 = vld [vmem:[#allocation11 + $0x8] sm:$0xff]   ;;  %v1377_v1 = vld [vmem:[#allocation11 + $0x18] sm:$0xff]  }
  0x83   :  { %v1376_v0 = vld [vmem:[#allocation11 + $0x10] sm:$0xff]   ;;  %v1378_v2 = vld [vmem:[#allocation11 + $0x20] sm:$0xff]   ;;  %v1379_v3 = vld [vmem:[#allocation11 + $0x28] sm:$0xff]  }
  0x84   :  { %1154 = vmatpush3.bf16.msra.mxu0 %v1331_v22  ;;  %v1140_v18 = vld [vmem:[#allocation8] sm:$0xff]   ;;  %v1380_v35 = vld [vmem:[#allocation11 + $0x30] sm:$0xff]  }
  0x85   :  { %1176 = vmatpush3.bf16.msra.mxu1 %v1332_v23  ;;  %1155 = vmatprep.subr.bf16.mxu0 %v1333_v24  ;;  %v1141_v22 = vunpack.c.l.bf16 %v1140_v18 }
  0x86   :  { %1177 = vmatprep.subr.bf16.mxu1 %v1334_v25 }
  0x88   :  { %1156 = vmatpush3.bf16.msra.mxu0 %v1335_v26 }
  0x89   :  { %1178 = vmatpush3.bf16.msra.mxu1 %v1336_v27  ;;  %1157 = vmatprep.subr.bf16.mxu0 %v1337_v28  ;;  %v1142_v27 = vunpack.c.h.bf16 %v1140_v18 }
  0x8a   :  { %1179 = vmatprep.subr.bf16.mxu1 %v1338_v29 }
  0x8c   :  { %1158 = vmatpush3.bf16.msra.mxu0 %v1339_v30 }
  0x8d   :  { %1180 = vmatpush3.bf16.msra.mxu1 %v1340_v31  ;;  %1187 = vmatprep.subr.bf16.mxu0 %v1347_v36  ;;  %v1381_v36 = vld [vmem:[#allocation11 + $0x38] sm:$0xff]  }
  0x8e   :  { %1239 = vmatprep.subr.bf16.mxu1 %v1366_v54 }
  0x8f   :  { %577 = vmatmul.mubr.bf16.vlgmr.msra.gmra.mrb[0].mxu0 %v1341_v32 }
  0x90   :  { %618 = vmatmul.mubr.bf16.vlgmr.msra.gmra.mrb[0].mxu1 %v1344_v34  ;;  %1188 = vmatpush3.bf16.msra.mxu0 %v1348_v37  ;;  %v1382_v37 = vld [vmem:[#allocation12] sm:$0xff]  }
  0x91   :  { %1189 = vmatprep.subr.bf16.mxu0 %v1349_v38  ;;  %658 = vmatprep.mubr.bf16.mxu0 %v1365_v47  ;;  %v1383_v38 = vld [vmem:[#allocation12 + $0x8] sm:$0xff]  }
  0x92   :  { %1240 = vmatpush3.bf16.msra.mxu1 %v1366_v54 }
  0x93   :  { %1241 = vmatprep.subr.bf16.mxu1 %v1367_v55 }
  0x94   :  { %1190 = vmatpush3.bf16.msra.mxu0 %v1350_v39  ;;  %v1384_v39 = vld [vmem:[#allocation12 + $0x10] sm:$0xff]  }
  0x95   :  { %1191 = vmatprep.subr.bf16.mxu0 %v1351_v40  ;;  %v1385_v40 = vld [vmem:[#allocation12 + $0x18] sm:$0xff]  }
  0x96   :  { %1242 = vmatpush3.bf16.msra.mxu1 %v1367_v55 }
  0x97   :  { %1243 = vmatprep.subr.bf16.mxu1 %v1368_v56 }
  0x98   :  { %1192 = vmatpush3.bf16.msra.mxu0 %v1352_v41  ;;  %v1386_v41 = vld [vmem:[#allocation12 + $0x20] sm:$0xff]  }
  0x99   :  { %1193 = vmatprep.subr.bf16.mxu0 %v1353_v42  ;;  %v1387_v42 = vld [vmem:[#allocation12 + $0x28] sm:$0xff]  }
  0x9a   :  { %1244 = vmatpush3.bf16.msra.mxu1 %v1368_v56 }
  0x9b   :  { %1245 = vmatprep.subr.bf16.mxu1 %v1369_v57 }
  0x9c   :  { %1194 = vmatpush3.bf16.msra.mxu0 %v1354_v43  ;;  %v706_v43 = vlaneseq }
  0x9d   :  { %1195 = vmatprep.subr.bf16.mxu0 %v1355_v44 }
  0x9e   :  { %1246 = vmatpush3.bf16.msra.mxu1 %v1369_v57  ;;  %v707_v44 = vshrl.u32 %v706_v43, 7  ;;  %v1388_v57 = vld [vmem:[#allocation12 + $0x30] sm:$0xff]  }
  0x9f   :  { %1247 = vmatprep.subr.bf16.mxu1 %v1370_v58 }
  0xa0   :  { %1196 = vmatpush3.bf16.msra.mxu0 %v1356_v45  ;;  %v704_v45 = vld [vmem:[%s1729_s4] sm:$0x1]  ;;  %v708_v47 = vsub.s32 0, %v707_v44 }
  0xa1   :  { %1197 = vmatprep.subr.bf16.mxu0 %v1357_v46  ;;  %v705_v46 = vunpack.c.l.bf16 %v704_v45 }
  0xa2   :  { %1248 = vmatpush3.bf16.msra.mxu1 %v1370_v58  ;;  %v1389_v58 = vld [vmem:[#allocation12 + $0x38] sm:$0xff]  }
  0xa3   :  { %1249 = vmatprep.subr.bf16.mxu1 %v1371_v59 }
  0xa4   :  { %1198 = vmatpush3.bf16.msra.mxu0 %v1358_v48  ;;  %v709_v48 = vrot.slane %v705_v46, %v708_v47 }
  0xa5   :  { %1199 = vmatprep.subr.bf16.mxu0 %v1359_v49 }
  0xa6   :  { %1250 = vmatpush3.bf16.msra.mxu1 %v1371_v59  ;;  %v823_v59 = vld [vmem:[%s1731_s6] sm:$0x1]  ;;  %s1564_s6 = smov [#allocation14]  }
  0xa7   :  { %1251 = vmatprep.subr.bf16.mxu1 %v1372_v60  ;;  %s1046_s21 = sshll.u32 %s1564_s6, 4  ;;  %s1047_s21 = int_to_ptr.vmem [resolvable:$true] %s1046_s21 }
  0xa8   :  { %1200 = vmatpush3.bf16.msra.mxu0 %v1360_v50  ;;  %s1522_s22 = scalar_lea.vmem %s1047_s21, 256  ;;  %p1527_p7 = scmp.lt.s32.totalorder %s1047_s21, %s1047_s21 }
  0xa9   :  { %1201 = vmatprep.subr.bf16.mxu0 %v1361_v51  ;;  %p1523_p6 = scmp.ne.s32.totalorder %s1047_s21, %s1522_s22  ;;  %p1528_p8 = scmp.lt.s32.totalorder %s1522_s22, %s1522_s22 }
  0xaa   :  { %1252 = vmatpush3.bf16.msra.mxu1 %v1372_v60  ;;  %v824_v60 = vunpack.c.l.bf16 %v823_v59 }
  0xab   :  { %1253 = vmatprep.subr.bf16.mxu1 %v1373_v61  ;;  %p1529_p9 = por %p1528_p8, %p1527_p7 }
  0xac   :  { %1202 = vmatpush3.bf16.msra.mxu0 %v1362_v52 }
  0xad   :  { %1258 = vmatprep.subr.bf16.mxu0 %v1374_v62  ;;  %p1530_p10 = pnand %p1529_p9, %p1523_p6 }
  0xae   :  { %1254 = vmatpush3.bf16.msra.mxu1 %v1373_v61  ;;  %v828_v61 = vrot.slane %v824_v60, %v708_v47 }
  0xaf   :  { %659 = vmatmul.mubr.bf16.vlgmr.msra.gmra.mrb[4].mxu0 %v1363_v53  ;;  %1277 = vmatprep.subr.bf16.mxu1 %v1382_v37 }
  0xb0   :  { %1259 = vmatpush3.bf16.msra.mxu0 %v1374_v62 }
  0xb1   :  { %1260 = vmatprep.subr.bf16.mxu0 %v1375_v63 }
  0xb4   :  { %1261 = vmatpush3.bf16.msra.mxu0 %v1375_v63 }
  0xb5   :  { %1262 = vmatprep.subr.bf16.mxu0 %v1376_v0 }
  0xb8   :  { %1263 = vmatpush3.bf16.msra.mxu0 %v1376_v0 }
  0xb9   :  { %1264 = vmatprep.subr.bf16.mxu0 %v1377_v1 }
  0xbc   :  { %1265 = vmatpush3.bf16.msra.mxu0 %v1377_v1 }
  0xbd   :  { %1266 = vmatprep.subr.bf16.mxu0 %v1378_v2 }
  0xc0   :  { %1267 = vmatpush3.bf16.msra.mxu0 %v1378_v2 }
  0xc1   :  { %1268 = vmatprep.subr.bf16.mxu0 %v1379_v3 }
  0xc4   :  { %1269 = vmatpush3.bf16.msra.mxu0 %v1379_v3 }
  0xc5   :  { %1270 = vmatprep.subr.bf16.mxu0 %v1380_v35 }
  0xc8   :  { %1271 = vmatpush3.bf16.msra.mxu0 %v1380_v35 }
  0xc9   :  { %1272 = vmatprep.subr.bf16.mxu0 %v1381_v36 }
  0xcc   :  { %1273 = vmatpush3.bf16.msra.mxu0 %v1381_v36 }
 0x162   :  { %v1159_v4 = vpop.f32.mrb[0].mxu0 }
 0x163   :  { %v1181_v5 = vpop.f32.mrb[0].mxu1  ;;  %v1160_v6 = vpop.f32.mrb[1].mxu0 }
 0x164   :  { %v1161_v7 = vadd.f32 %v1160_v6, %v1159_v4  ;;  %v1182_v8 = vpop.f32.mrb[1].mxu1  ;;  %v1162_v9 = vpop.f32.mrb[2].mxu0  ;;  %v942_v6 = vld [vmem:[%s1733_s8] sm:$0x1] }
 0x165   :  { %v1183_v10 = vadd.f32 %v1182_v8, %v1181_v5  ;;  %v1184_v11 = vpop.f32.mrb[2].mxu1  ;;  %v1163_v12 = vpop.f32.mrb[3].mxu0 }
 0x166   :  { %v1164_v13 = vadd.f32 %v1163_v12, %v1162_v9  ;;  %v1185_v14 = vpop.f32.mrb[3].mxu1 }
 0x167   :  { %v620_v15 = vadd.f32 %v1183_v10, %v1161_v7  ;;  %v1186_v16 = vadd.f32 %v1185_v14, %v1184_v11  ;;  %v943_v7 = vunpack.c.l.bf16 %v942_v6 }
 0x169   :  { %v623_v17 = vadd.f32 %v1186_v16, %v1164_v13  ;;  %v947_v8 = vrot.slane %v943_v7, %v708_v47 }
 0x182   :  { %v1203_v19 = vpop.f32.mrb[4].mxu0 }
 0x183   :  { %v1204_v20 = vpop.f32.mrb[5].mxu0 }
 0x184   :  { %v1205_v21 = vadd.f32 %v1204_v20, %v1203_v19  ;;  %v1206_v23 = vpop.f32.mrb[6].mxu0 }
 0x185   :  { %v1207_v24 = vpop.f32.mrb[7].mxu0 }
 0x186   :  { %v661_v25 = vadd.f32 %v1205_v21, %v620_v15  ;;  %v1208_v26 = vadd.f32 %v1207_v24, %v1206_v23 }
 0x188   :  { %v680_v28 = vadd.f32 %v1141_v22, %v661_v25  ;;  %v664_v29 = vadd.f32 %v1208_v26, %v623_v17 }
 0x18a   :  { %v681_v30 = vadd.f32 %v1142_v27, %v664_v29  ;;  %vm682_vm0 = vcmp.gt.f32.partialorder %v680_v28, 0.0  ;;  %v684_v31 = vmul.f32 0.2, %v680_v28 }
 0x18c   :  { %v686_v32 = vsel %vm682_vm0, %v680_v28, %v684_v31  ;;  %vm683_vm1 = vcmp.gt.f32.partialorder %v681_v30, 0.0  ;;  %v685_v33 = vmul.f32 0.2, %v681_v30 }
 0x18d   :  { %1255 = vmatprep.mubr.f32.mxu1 %v686_v32 }
 0x18e   :  { %v687_v34 = vsel %vm683_vm1, %v681_v30, %v685_v33 }
 0x18f   :  { %1256 = vmatmul.mubr.f32.vlgmr.msra.gmra.mrb[4].mxu1 %v687_v34 }
 0x190   :  { %1278 = vmatpush3.bf16.msra.mxu1 %v1382_v37 }
 0x191   :  { %1279 = vmatprep.subr.bf16.mxu1 %v1383_v38 }
 0x194   :  { %1280 = vmatpush3.bf16.msra.mxu1 %v1383_v38 }
 0x195   :  { %1281 = vmatprep.subr.bf16.mxu1 %v1384_v39 }
 0x198   :  { %1282 = vmatpush3.bf16.msra.mxu1 %v1384_v39 }
 0x199   :  { %1283 = vmatprep.subr.bf16.mxu1 %v1385_v40 }
 0x19c   :  { %1284 = vmatpush3.bf16.msra.mxu1 %v1385_v40 }
 0x19d   :  { %1285 = vmatprep.subr.bf16.mxu1 %v1386_v41 }
 0x1a0   :  { %1286 = vmatpush3.bf16.msra.mxu1 %v1386_v41 }
 0x1a1   :  { %1287 = vmatprep.subr.bf16.mxu1 %v1387_v42 }
 0x1a4   :  { %1288 = vmatpush3.bf16.msra.mxu1 %v1387_v42 }
 0x1a5   :  { %1289 = vmatprep.subr.bf16.mxu1 %v1388_v57 }
 0x1a8   :  { %1290 = vmatpush3.bf16.msra.mxu1 %v1388_v57 }
 0x1a9   :  { %1291 = vmatprep.subr.bf16.mxu1 %v1389_v58 }
 0x1ac   :  { %1292 = vmatpush3.bf16.msra.mxu1 %v1389_v58 }
 0x262   :  { %v1257_v49 = vpop.f32.mrb[4].mxu1 }
 0x263   :  { %v798_v50 = vadd.f32 %v1257_v49, %v709_v48  ;;  %v792_v51 = vpop.f32.mrb[5].mxu1 }
 0x264   :  { %v793_v52 = vadd.f32 %v792_v51, %v709_v48 }
 0x265   :  { %v804_v53 = vmul.f32 0.2, %v798_v50  ;;  %vm802_vm2 = vcmp.gt.f32.partialorder %v798_v50, 0.0 }
 0x266   :  { %v803_v54 = vmul.f32 0.2, %v793_v52  ;;  %vm801_vm3 = vcmp.gt.f32.partialorder %v793_v52, 0.0 }
 0x267   :  { %v806_v56 = vsel %vm802_vm2, %v798_v50, %v804_v53 }
 0x268   :  { %v805_v55 = vsel %vm801_vm3, %v793_v52, %v803_v54 }
 0x269   :  { %1274 = vmatprep.mubr.f32.mxu0 %v805_v55 }
 0x26a   :  { %1275 = vmatmul.mubr.f32.vlgmr.msra.gmra.mrb[8].mxu0 %v806_v56 }
 0x33d   :  { %v1276_v62 = vpop.f32.mrb[8].mxu0 }
 0x33e   :  { %v917_v63 = vadd.f32 %v1276_v62, %v828_v61  ;;  %v911_v0 = vpop.f32.mrb[9].mxu0 }
 0x33f   :  { %v912_v1 = vadd.f32 %v911_v0, %v828_v61 }
 0x340   :  { %v923_v2 = vmul.f32 0.2, %v917_v63  ;;  %vm921_vm4 = vcmp.gt.f32.partialorder %v917_v63, 0.0 }
 0x341   :  { %v922_v3 = vmul.f32 0.2, %v912_v1  ;;  %vm920_vm5 = vcmp.gt.f32.partialorder %v912_v1, 0.0 }
 0x342   :  { %v925_v5 = vsel %vm921_vm4, %v917_v63, %v923_v2 }
 0x343   :  { %v924_v4 = vsel %vm920_vm5, %v912_v1, %v922_v3 }
 0x344   :  { %1293 = vmatprep.mubr.f32.mxu1 %v924_v4 }
 0x345   :  { %1294 = vmatmul.mubr.f32.vlgmr.msra.gmra.mrb[6].mxu1 %v925_v5 }
 0x418   :  { %v1295_v9 = vpop.f32.mrb[6].mxu1 }
 0x419   :  { %v1036_v10 = vadd.f32 %v1295_v9, %v947_v8  ;;  %v1030_v11 = vpop.f32.mrb[7].mxu1 }
 0x41a   :  { %v1031_v12 = vadd.f32 %v1030_v11, %v947_v8 }
 0x41b   :  { %1040 = vst [vmem:[#allocation14 + $0x8] sm:$0xff] %v1036_v10 }
 0x41c   :  { %1039 = vst [vmem:[#allocation14] sm:$0xff] %v1031_v12 }
 0x41d   :  { %1533 = shalt.err (!%p1530_p10)
}
 0x41e   :  { %s1534_s25 = scalar_lea.hbm %s1734_s9, 256 }
 0x41f   :  { %p1535_p11 = scmp.ne.s32.totalorder %s1734_s9, %s1534_s25  ;;  %p1538_p12 = scmp.lt.u32.totalorder %s1534_s25, %s1734_s9 }
 0x421   :  { %p1540_p13 = pnand %p1538_p12, %p1535_p11 }
 0x423   :  { %1543 = shalt.err (!%p1540_p13)
}
 0x424   :  { %s1565_s2 = smov 128   ;;  %s1566_s29 = smov 8  }
 0x425   :  { %1052 = dma.vmem_to_hbm [thread:$0]  %s1047_s21, 256, %s1734_s9, [#allocation5], %s1565_s2, %s1565_s2, %s1566_s29  }
 0x426   :  { %1552 = dma.done.wait [#allocation5], 256  }
 0x427   :  { %1553 = vsyncadd [#allocation5], 4294967040 }
 0x428   :  { %1056 = vsyncpa [#allocation4], 1 }
 0x429   :  { %1057 = vsyncpa [#allocation7], 1 }
 0x42a   :  { %1058 = vsyncpa [#allocation10], 1 }
 0x42b   :  { %1059 = vsyncpa [#allocation13], 1 }
 0x42c   :  { %1060 = vsyncpa [#allocation5], 1 }

</bundles_post_ra>
